<compile_context>
chip_gen: v5e
topology: v5e:2x2
jax: 0.10.0
libtpu: 0.0.40
codegen_flags: <defaults>
</compile_context>

<pallas_src>
import jax
import jax.numpy as jnp
from jax.experimental import pallas as pl
from jax.experimental.pallas import tpu as pltpu


def _layernorm(v, w, b, eps=1e-5):
    mu = jnp.mean(v, axis=-1, keepdims=True)
    var = jnp.mean((v - mu) ** 2, axis=-1, keepdims=True)
    return (v - mu) * jax.lax.rsqrt(var + eps) * w + b


def tfs_layer_kernel(x_ref,
                     wq_ref, wk_ref, wv_ref,
                     bq_ref, bk_ref, bv_ref,
                     wo_ref, bo_ref,
                     ln1w_ref, ln1b_ref,
                     w1_ref, b1_ref,
                     w2_ref, b2_ref,
                     ln2w_ref, ln2b_ref,
                     o_ref):
    bt, S, D = x_ref.shape
    nhead = wq_ref.shape[0]

    x = x_ref[...].reshape(bt * S, D)          # f32 activations / residual path
    xb = x.astype(jnp.bfloat16)                # bf16 operands for the MXU

    # ---- multi-head self-attention on raw x (post-norm layer) ----
    attn = jnp.zeros((bt * S, D), jnp.float32)
    for h in range(nhead):                     # static loop; weights indexed on
        # per-head projections, contraction depth D, f32 accumulation.
        # (scale 1/sqrt(hd) is already folded into wq/bq on the host)
        qh = (jnp.dot(xb, wq_ref[h], preferred_element_type=jnp.float32)
              + bq_ref[h]).astype(jnp.bfloat16)
        kh = (jnp.dot(xb, wk_ref[h], preferred_element_type=jnp.float32)
              + bk_ref[h]).astype(jnp.bfloat16)
        vh = (jnp.dot(xb, wv_ref[h], preferred_element_type=jnp.float32)
              + bv_ref[h]).astype(jnp.bfloat16)

        ctx_rows = []
        for b in range(bt):                    # static loop over batch tile
            r = slice(b * S, (b + 1) * S)      # sublane-aligned row slice
            s = jnp.dot(qh[r], kh[r].T, preferred_element_type=jnp.float32)
            s = s - jnp.max(s, axis=-1, keepdims=True)
            p = jnp.exp(s)                                        # f32 softmax
            p = p * pl.reciprocal(jnp.sum(p, axis=-1, keepdims=True),
                                  approx=True)                    # EUP recip
            ctx_rows.append(jnp.dot(p.astype(jnp.bfloat16), vh[r],
                                    preferred_element_type=jnp.float32))
        ctx = ctx_rows[0] if bt == 1 else jnp.concatenate(ctx_rows, axis=0)

        # output projection accumulated per head: no (S, D) concatenate needed.
        attn = attn + jnp.dot(ctx.astype(jnp.bfloat16), wo_ref[h],
                              preferred_element_type=jnp.float32)

    attn = attn + bo_ref[...]
    x1 = _layernorm(x + attn, ln1w_ref[...], ln1b_ref[...])      # POST-norm 1

    # ---- feed-forward block ----
    ff = jnp.dot(x1.astype(jnp.bfloat16), w1_ref[...],
                 preferred_element_type=jnp.float32) + b1_ref[...]
    ff = jnp.maximum(ff, 0.0)
    ff = jnp.dot(ff.astype(jnp.bfloat16), w2_ref[...],
                 preferred_element_type=jnp.float32) + b2_ref[...]
    x2 = _layernorm(x1 + ff, ln2w_ref[...], ln2b_ref[...])       # POST-norm 2

    o_ref[...] = x2.reshape(bt, S, D)


def _pick_block_b(B, S, D):
    """Batch elements per grid step: big enough to amortize per-step overhead,
    but keep >= 2 parallel steps (v7x dual TensorCores) and a bounded unroll."""
    target = max(1, (2 * 1024 * 1024) // (S * D * 4))
    bb = min(B, target, 8)
    if B >= 2:
        bb = max(1, min(bb, B // 2))
    while B % bb:
        bb -= 1
    return max(bb, 1)


def _pack_params(params, nhead):
    """Split / transpose PyTorch-layout weights into per-head, MXU-friendly
    bf16 blocks; fold the attention scale into the Q projection."""
    D = params["wo_t"].shape[0]
    hd = D // nhead
    scale = 1.0 / float(hd) ** 0.5
    wqkv = params["wqkv_t"]                       # (D, 3D) = in_proj_weight.T
    bqkv = params["bqkv"]                         # (3D,)

    def w_heads(m):                               # (D, D) -> (nhead, D, hd)
        return m.reshape(D, nhead, hd).transpose(1, 0, 2)

    def b_heads(v):                               # (D,) -> (nhead, 1, hd)
        return v.reshape(nhead, 1, hd)

    bf16 = jnp.bfloat16
    return dict(
        wq=(w_heads(wqkv[:, :D]) * scale).astype(bf16),
        wk=w_heads(wqkv[:, D:2 * D]).astype(bf16),
        wv=w_heads(wqkv[:, 2 * D:]).astype(bf16),
        bq=(b_heads(bqkv[:D]) * scale).astype(jnp.float32),
        bk=b_heads(bqkv[D:2 * D]).astype(jnp.float32),
        bv=b_heads(bqkv[2 * D:]).astype(jnp.float32),
        wo=params["wo_t"].reshape(nhead, hd, D).astype(bf16),
        bo=params["bo"].reshape(1, D).astype(jnp.float32),
        ln1w=params["ln1_w"].reshape(1, D).astype(jnp.float32),
        ln1b=params["ln1_b"].reshape(1, D).astype(jnp.float32),
        w1=params["w1_t"].astype(bf16),
        b1=params["b1"].reshape(1, -1).astype(jnp.float32),
        w2=params["w2_t"].astype(bf16),
        b2=params["b2"].reshape(1, D).astype(jnp.float32),
        ln2w=params["ln2_w"].reshape(1, D).astype(jnp.float32),
        ln2b=params["ln2_b"].reshape(1, D).astype(jnp.float32),
    )


def tfs_encoder_layer(x, params, nhead, block_b=None):
    """x: (B, S, D) float32. params: dict of transposed PyTorch weights."""
    B, S, D = x.shape
    if block_b is None:
        block_b = _pick_block_b(B, S, D)
    assert B % block_b == 0

    p = _pack_params(params, nhead)
    args = (
        x,
        p["wq"], p["wk"], p["wv"],
        p["bq"], p["bk"], p["bv"],
        p["wo"], p["bo"],
        p["ln1w"], p["ln1b"],
        p["w1"], p["b1"],
        p["w2"], p["b2"],
        p["ln2w"], p["ln2b"],
    )

    def const_spec(a):  # whole array resident, grid-invariant
        nd = a.ndim
        return pl.BlockSpec(a.shape, lambda i, nd=nd: (0,) * nd)

    in_specs = [pl.BlockSpec((block_b, S, D), lambda i: (i, 0, 0))]
    in_specs += [const_spec(a) for a in args[1:]]

    return pl.pallas_call(
        tfs_layer_kernel,
        out_shape=jax.ShapeDtypeStruct((B, S, D), jnp.float32),
        grid=(B // block_b,),
        in_specs=in_specs,
        out_specs=pl.BlockSpec((block_b, S, D), lambda i: (i, 0, 0)),
        compiler_params=pltpu.CompilerParams(
            dimension_semantics=("parallel",)),
    )(*args)


def reference_layer(x, p, nhead):
    """Pure-JAX f32 reference mirroring the PyTorch post-norm forward exactly."""
    B, S, D = x.shape
    hd = D // nhead
    scale = 1.0 / float(hd) ** 0.5

    def ln(v, w, b):
        mu = jnp.mean(v, axis=-1, keepdims=True)
        var = jnp.mean((v - mu) ** 2, axis=-1, keepdims=True)
        return (v - mu) / jnp.sqrt(var + 1e-5) * w + b

    qkv = x @ p["wqkv_t"] + p["bqkv"]
    q, k, v = qkv[..., :D], qkv[..., D:2 * D], qkv[..., 2 * D:]
    q = q.reshape(B, S, nhead, hd).transpose(0, 2, 1, 3)
    k = k.reshape(B, S, nhead, hd).transpose(0, 2, 1, 3)
    v = v.reshape(B, S, nhead, hd).transpose(0, 2, 1, 3)
    s = jnp.einsum("bhqd,bhkd->bhqk", q, k) * scale
    pattn = jax.nn.softmax(s, axis=-1)
    ctx = jnp.einsum("bhqk,bhkd->bhqd", pattn, v)
    ctx = ctx.transpose(0, 2, 1, 3).reshape(B, S, D)
    attn = ctx @ p["wo_t"] + p["bo"]
    x1 = ln(x + attn, p["ln1_w"], p["ln1_b"])
    ff = jnp.maximum(x1 @ p["w1_t"] + p["b1"], 0.0) @ p["w2_t"] + p["b2"]
    return ln(x1 + ff, p["ln2_w"], p["ln2_b"])


def make_params(key, dim_h):
    D = dim_h
    ks = jax.random.split(key, 8)
    sc = 0.1
    return {
        # MultiheadAttention in_proj (3D, D) stored transposed -> (D, 3D)
        "wqkv_t": sc * jax.random.normal(ks[0], (D, 3 * D), jnp.float32),
        "bqkv":   sc * jax.random.normal(ks[1], (3 * D,), jnp.float32),
        # out_proj (D, D) transposed
        "wo_t":   sc * jax.random.normal(ks[2], (D, D), jnp.float32),
        "bo":     sc * jax.random.normal(ks[3], (D,), jnp.float32),
        # linear1 (2D, D) transposed -> (D, 2D); linear2 (D, 2D) -> (2D, D)
        "w1_t":   sc * jax.random.normal(ks[4], (D, 2 * D), jnp.float32),
        "b1":     sc * jax.random.normal(ks[5], (2 * D,), jnp.float32),
        "w2_t":   sc * jax.random.normal(ks[6], (2 * D, D), jnp.float32),
        "b2":     sc * jax.random.normal(ks[7], (D,), jnp.float32),
        # LayerNorm affine params (PyTorch default init: ones / zeros)
        "ln1_w": jnp.ones((D,), jnp.float32),
        "ln1_b": jnp.zeros((D,), jnp.float32),
        "ln2_w": jnp.ones((D,), jnp.float32),
        "ln2_b": jnp.zeros((D,), jnp.float32),
    }


if __name__ == "__main__":
    B, S, D, NHEAD = 2, 8, 32, 4
    key = jax.random.PRNGKey(0)
    kx, kp = jax.random.split(key)
    x = jax.random.normal(kx, (B, S, D), jnp.float32)
    params = make_params(kp, D)

    out = tfs_encoder_layer(x, params, NHEAD)
    out = jax.block_until_ready(out)

    ref = reference_layer(x, params, NHEAD)
    assert out.shape == (B, S, D)
    max_err = float(jnp.max(jnp.abs(out - ref)))
    assert jnp.allclose(out, ref, atol=3e-2, rtol=3e-2), (
        f"mismatch vs reference (max abs err {max_err})")
    print("KERNEL_OK")
</pallas_src>

<mosaic_0001>
module attributes {stable_mosaic.version = 11 : i64} {
  func.func @tfs_layer_kernel(%arg0: i32, %arg1: memref<1x8x32xf32, #tpu.memory_space<vmem>>, %arg2: memref<4x32x8xbf16, #tpu.memory_space<vmem>>, %arg3: memref<4x32x8xbf16, #tpu.memory_space<vmem>>, %arg4: memref<4x32x8xbf16, #tpu.memory_space<vmem>>, %arg5: memref<4x1x8xf32, #tpu.memory_space<vmem>>, %arg6: memref<4x1x8xf32, #tpu.memory_space<vmem>>, %arg7: memref<4x1x8xf32, #tpu.memory_space<vmem>>, %arg8: memref<4x8x32xbf16, #tpu.memory_space<vmem>>, %arg9: memref<1x32xf32, #tpu.memory_space<vmem>>, %arg10: memref<1x32xf32, #tpu.memory_space<vmem>>, %arg11: memref<1x32xf32, #tpu.memory_space<vmem>>, %arg12: memref<32x64xbf16, #tpu.memory_space<vmem>>, %arg13: memref<1x64xf32, #tpu.memory_space<vmem>>, %arg14: memref<64x32xbf16, #tpu.memory_space<vmem>>, %arg15: memref<1x32xf32, #tpu.memory_space<vmem>>, %arg16: memref<1x32xf32, #tpu.memory_space<vmem>>, %arg17: memref<1x32xf32, #tpu.memory_space<vmem>>, %arg18: memref<1x8x32xf32, #tpu.memory_space<vmem>>) attributes {dimension_semantics = [#tpu.dimension_semantics<parallel>], iteration_bounds = array<i64: 2>, scalar_prefetch = 0 : i64, scratch_operands = 0 : i64, tpu.core_type = #tpu.core_type<tc>, window_params = [{transform_indices = @transform_0, window_bounds = array<i64: 1, 8, 32>}, {pipeline_mode = #tpu.pipeline_mode<synchronous>, transform_indices = @transform_1, window_bounds = array<i64: 4, 32, 8>}, {pipeline_mode = #tpu.pipeline_mode<synchronous>, transform_indices = @transform_2, window_bounds = array<i64: 4, 32, 8>}, {pipeline_mode = #tpu.pipeline_mode<synchronous>, transform_indices = @transform_3, window_bounds = array<i64: 4, 32, 8>}, {pipeline_mode = #tpu.pipeline_mode<synchronous>, transform_indices = @transform_4, window_bounds = array<i64: 4, 1, 8>}, {pipeline_mode = #tpu.pipeline_mode<synchronous>, transform_indices = @transform_5, window_bounds = array<i64: 4, 1, 8>}, {pipeline_mode = #tpu.pipeline_mode<synchronous>, transform_indices = @transform_6, window_bounds = array<i64: 4, 1, 8>}, {pipeline_mode = #tpu.pipeline_mode<synchronous>, transform_indices = @transform_7, window_bounds = array<i64: 4, 8, 32>}, {pipeline_mode = #tpu.pipeline_mode<synchronous>, transform_indices = @transform_8, window_bounds = array<i64: 1, 32>}, {pipeline_mode = #tpu.pipeline_mode<synchronous>, transform_indices = @transform_9, window_bounds = array<i64: 1, 32>}, {pipeline_mode = #tpu.pipeline_mode<synchronous>, transform_indices = @transform_10, window_bounds = array<i64: 1, 32>}, {pipeline_mode = #tpu.pipeline_mode<synchronous>, transform_indices = @transform_11, window_bounds = array<i64: 32, 64>}, {pipeline_mode = #tpu.pipeline_mode<synchronous>, transform_indices = @transform_12, window_bounds = array<i64: 1, 64>}, {pipeline_mode = #tpu.pipeline_mode<synchronous>, transform_indices = @transform_13, window_bounds = array<i64: 64, 32>}, {pipeline_mode = #tpu.pipeline_mode<synchronous>, transform_indices = @transform_14, window_bounds = array<i64: 1, 32>}, {pipeline_mode = #tpu.pipeline_mode<synchronous>, transform_indices = @transform_15, window_bounds = array<i64: 1, 32>}, {pipeline_mode = #tpu.pipeline_mode<synchronous>, transform_indices = @transform_16, window_bounds = array<i64: 1, 32>}, {transform_indices = @transform_17, window_bounds = array<i64: 1, 8, 32>}]} {
    %c0 = arith.constant 0 : index
    %c0_0 = arith.constant 0 : index
    %c0_1 = arith.constant 0 : index
    %0 = vector.load %arg1[%c0, %c0_0, %c0_1] : memref<1x8x32xf32, #tpu.memory_space<vmem>>, vector<1x8x32xf32>
    %1 = vector.shape_cast %0 : vector<1x8x32xf32> to vector<8x32xf32>
    %2 = arith.truncf %1 : vector<8x32xf32> to vector<8x32xbf16>
    %cst = arith.constant 0.000000e+00 : f32
    %3 = vector.broadcast %cst : f32 to vector<8x32xf32>
    %c0_2 = arith.constant 0 : index
    %c0_3 = arith.constant 0 : index
    %c0_4 = arith.constant 0 : index
    %4 = vector.load %arg2[%c0_2, %c0_3, %c0_4] : memref<4x32x8xbf16, #tpu.memory_space<vmem>>, vector<1x32x8xbf16>
    %5 = vector.shape_cast %4 : vector<1x32x8xbf16> to vector<32x8xbf16>
    %cst_5 = arith.constant dense<0.000000e+00> : vector<8x8xf32>
    %6 = tpu.matmul %2, %5, %cst_5 {dimension_numbers = #tpu.dot_dimension_numbers<[1], [0], [0], [1], [0, 0, 1, 1], [], []>} : vector<8x32xbf16>, vector<32x8xbf16>, vector<8x8xf32> -> vector<8x8xf32>
    %c0_6 = arith.constant 0 : index
    %c0_7 = arith.constant 0 : index
    %c0_8 = arith.constant 0 : index
    %7 = vector.load %arg5[%c0_6, %c0_7, %c0_8] : memref<4x1x8xf32, #tpu.memory_space<vmem>>, vector<1x1x8xf32>
    %8 = vector.shape_cast %7 : vector<1x1x8xf32> to vector<1x8xf32>
    %9 = vector.broadcast %8 : vector<1x8xf32> to vector<8x8xf32>
    %10 = arith.addf %6, %9 : vector<8x8xf32>
    %11 = arith.truncf %10 : vector<8x8xf32> to vector<8x8xbf16>
    %c0_9 = arith.constant 0 : index
    %c0_10 = arith.constant 0 : index
    %c0_11 = arith.constant 0 : index
    %12 = vector.load %arg3[%c0_9, %c0_10, %c0_11] : memref<4x32x8xbf16, #tpu.memory_space<vmem>>, vector<1x32x8xbf16>
    %13 = vector.shape_cast %12 : vector<1x32x8xbf16> to vector<32x8xbf16>
    %cst_12 = arith.constant dense<0.000000e+00> : vector<8x8xf32>
    %14 = tpu.matmul %2, %13, %cst_12 {dimension_numbers = #tpu.dot_dimension_numbers<[1], [0], [0], [1], [0, 0, 1, 1], [], []>} : vector<8x32xbf16>, vector<32x8xbf16>, vector<8x8xf32> -> vector<8x8xf32>
    %c0_13 = arith.constant 0 : index
    %c0_14 = arith.constant 0 : index
    %c0_15 = arith.constant 0 : index
    %15 = vector.load %arg6[%c0_13, %c0_14, %c0_15] : memref<4x1x8xf32, #tpu.memory_space<vmem>>, vector<1x1x8xf32>
    %16 = vector.shape_cast %15 : vector<1x1x8xf32> to vector<1x8xf32>
    %17 = vector.broadcast %16 : vector<1x8xf32> to vector<8x8xf32>
    %18 = arith.addf %14, %17 : vector<8x8xf32>
    %19 = arith.truncf %18 : vector<8x8xf32> to vector<8x8xbf16>
    %c0_16 = arith.constant 0 : index
    %c0_17 = arith.constant 0 : index
    %c0_18 = arith.constant 0 : index
    %20 = vector.load %arg4[%c0_16, %c0_17, %c0_18] : memref<4x32x8xbf16, #tpu.memory_space<vmem>>, vector<1x32x8xbf16>
    %21 = vector.shape_cast %20 : vector<1x32x8xbf16> to vector<32x8xbf16>
    %cst_19 = arith.constant dense<0.000000e+00> : vector<8x8xf32>
    %22 = tpu.matmul %2, %21, %cst_19 {dimension_numbers = #tpu.dot_dimension_numbers<[1], [0], [0], [1], [0, 0, 1, 1], [], []>} : vector<8x32xbf16>, vector<32x8xbf16>, vector<8x8xf32> -> vector<8x8xf32>
    %c0_20 = arith.constant 0 : index
    %c0_21 = arith.constant 0 : index
    %c0_22 = arith.constant 0 : index
    %23 = vector.load %arg7[%c0_20, %c0_21, %c0_22] : memref<4x1x8xf32, #tpu.memory_space<vmem>>, vector<1x1x8xf32>
    %24 = vector.shape_cast %23 : vector<1x1x8xf32> to vector<1x8xf32>
    %25 = vector.broadcast %24 : vector<1x8xf32> to vector<8x8xf32>
    %26 = arith.addf %22, %25 : vector<8x8xf32>
    %27 = arith.truncf %26 : vector<8x8xf32> to vector<8x8xbf16>
    %28 = tpu.transpose %19, [1, 0] : vector<8x8xbf16> -> vector<8x8xbf16>
    %cst_23 = arith.constant dense<0.000000e+00> : vector<8x8xf32>
    %29 = tpu.matmul %11, %28, %cst_23 {dimension_numbers = #tpu.dot_dimension_numbers<[1], [0], [0], [1], [0, 0, 1, 1], [], []>} : vector<8x8xbf16>, vector<8x8xbf16>, vector<8x8xf32> -> vector<8x8xf32>
    %cst_24 = arith.constant dense<0xFF800000> : vector<8xf32>
    %30 = vector.multi_reduction <maximumf>, %29, %cst_24 [1] : vector<8x8xf32> to vector<8xf32>
    %31 = vector.shape_cast %30 : vector<8xf32> to vector<8x1xf32>
    %32 = vector.broadcast %31 : vector<8x1xf32> to vector<8x8xf32>
    %33 = arith.subf %29, %32 : vector<8x8xf32>
    %34 = math.exp %33 : vector<8x8xf32>
    %cst_25 = arith.constant dense<0.000000e+00> : vector<8xf32>
    %35 = vector.multi_reduction <add>, %34, %cst_25 [1] : vector<8x8xf32> to vector<8xf32>
    %36 = vector.shape_cast %35 : vector<8xf32> to vector<8x1xf32>
    %37 = tpu.reciprocal %36 {approx = true} : vector<8x1xf32> -> vector<8x1xf32>
    %38 = vector.broadcast %37 : vector<8x1xf32> to vector<8x8xf32>
    %39 = arith.mulf %34, %38 : vector<8x8xf32>
    %40 = arith.truncf %39 : vector<8x8xf32> to vector<8x8xbf16>
    %cst_26 = arith.constant dense<0.000000e+00> : vector<8x8xf32>
    %41 = tpu.matmul %40, %27, %cst_26 {dimension_numbers = #tpu.dot_dimension_numbers<[1], [0], [0], [1], [0, 0, 1, 1], [], []>} : vector<8x8xbf16>, vector<8x8xbf16>, vector<8x8xf32> -> vector<8x8xf32>
    %42 = arith.truncf %41 : vector<8x8xf32> to vector<8x8xbf16>
    %c0_27 = arith.constant 0 : index
    %c0_28 = arith.constant 0 : index
    %c0_29 = arith.constant 0 : index
    %43 = vector.load %arg8[%c0_27, %c0_28, %c0_29] : memref<4x8x32xbf16, #tpu.memory_space<vmem>>, vector<1x8x32xbf16>
    %44 = vector.shape_cast %43 : vector<1x8x32xbf16> to vector<8x32xbf16>
    %cst_30 = arith.constant dense<0.000000e+00> : vector<8x32xf32>
    %45 = tpu.matmul %42, %44, %cst_30 {dimension_numbers = #tpu.dot_dimension_numbers<[1], [0], [0], [1], [0, 0, 1, 1], [], []>} : vector<8x8xbf16>, vector<8x32xbf16>, vector<8x32xf32> -> vector<8x32xf32>
    %46 = arith.addf %3, %45 : vector<8x32xf32>
    %c1 = arith.constant 1 : index
    %c0_31 = arith.constant 0 : index
    %c0_32 = arith.constant 0 : index
    %47 = vector.load %arg2[%c1, %c0_31, %c0_32] : memref<4x32x8xbf16, #tpu.memory_space<vmem>>, vector<1x32x8xbf16>
    %48 = vector.shape_cast %47 : vector<1x32x8xbf16> to vector<32x8xbf16>
    %cst_33 = arith.constant dense<0.000000e+00> : vector<8x8xf32>
    %49 = tpu.matmul %2, %48, %cst_33 {dimension_numbers = #tpu.dot_dimension_numbers<[1], [0], [0], [1], [0, 0, 1, 1], [], []>} : vector<8x32xbf16>, vector<32x8xbf16>, vector<8x8xf32> -> vector<8x8xf32>
    %c1_34 = arith.constant 1 : index
    %c0_35 = arith.constant 0 : index
    %c0_36 = arith.constant 0 : index
    %50 = vector.load %arg5[%c1_34, %c0_35, %c0_36] : memref<4x1x8xf32, #tpu.memory_space<vmem>>, vector<1x1x8xf32>
    %51 = vector.shape_cast %50 : vector<1x1x8xf32> to vector<1x8xf32>
    %52 = vector.broadcast %51 : vector<1x8xf32> to vector<8x8xf32>
    %53 = arith.addf %49, %52 : vector<8x8xf32>
    %54 = arith.truncf %53 : vector<8x8xf32> to vector<8x8xbf16>
    %c1_37 = arith.constant 1 : index
    %c0_38 = arith.constant 0 : index
    %c0_39 = arith.constant 0 : index
    %55 = vector.load %arg3[%c1_37, %c0_38, %c0_39] : memref<4x32x8xbf16, #tpu.memory_space<vmem>>, vector<1x32x8xbf16>
    %56 = vector.shape_cast %55 : vector<1x32x8xbf16> to vector<32x8xbf16>
    %cst_40 = arith.constant dense<0.000000e+00> : vector<8x8xf32>
    %57 = tpu.matmul %2, %56, %cst_40 {dimension_numbers = #tpu.dot_dimension_numbers<[1], [0], [0], [1], [0, 0, 1, 1], [], []>} : vector<8x32xbf16>, vector<32x8xbf16>, vector<8x8xf32> -> vector<8x8xf32>
    %c1_41 = arith.constant 1 : index
    %c0_42 = arith.constant 0 : index
    %c0_43 = arith.constant 0 : index
    %58 = vector.load %arg6[%c1_41, %c0_42, %c0_43] : memref<4x1x8xf32, #tpu.memory_space<vmem>>, vector<1x1x8xf32>
    %59 = vector.shape_cast %58 : vector<1x1x8xf32> to vector<1x8xf32>
    %60 = vector.broadcast %59 : vector<1x8xf32> to vector<8x8xf32>
    %61 = arith.addf %57, %60 : vector<8x8xf32>
    %62 = arith.truncf %61 : vector<8x8xf32> to vector<8x8xbf16>
    %c1_44 = arith.constant 1 : index
    %c0_45 = arith.constant 0 : index
    %c0_46 = arith.constant 0 : index
    %63 = vector.load %arg4[%c1_44, %c0_45, %c0_46] : memref<4x32x8xbf16, #tpu.memory_space<vmem>>, vector<1x32x8xbf16>
    %64 = vector.shape_cast %63 : vector<1x32x8xbf16> to vector<32x8xbf16>
    %cst_47 = arith.constant dense<0.000000e+00> : vector<8x8xf32>
    %65 = tpu.matmul %2, %64, %cst_47 {dimension_numbers = #tpu.dot_dimension_numbers<[1], [0], [0], [1], [0, 0, 1, 1], [], []>} : vector<8x32xbf16>, vector<32x8xbf16>, vector<8x8xf32> -> vector<8x8xf32>
    %c1_48 = arith.constant 1 : index
    %c0_49 = arith.constant 0 : index
    %c0_50 = arith.constant 0 : index
    %66 = vector.load %arg7[%c1_48, %c0_49, %c0_50] : memref<4x1x8xf32, #tpu.memory_space<vmem>>, vector<1x1x8xf32>
    %67 = vector.shape_cast %66 : vector<1x1x8xf32> to vector<1x8xf32>
    %68 = vector.broadcast %67 : vector<1x8xf32> to vector<8x8xf32>
    %69 = arith.addf %65, %68 : vector<8x8xf32>
    %70 = arith.truncf %69 : vector<8x8xf32> to vector<8x8xbf16>
    %71 = tpu.transpose %62, [1, 0] : vector<8x8xbf16> -> vector<8x8xbf16>
    %cst_51 = arith.constant dense<0.000000e+00> : vector<8x8xf32>
    %72 = tpu.matmul %54, %71, %cst_51 {dimension_numbers = #tpu.dot_dimension_numbers<[1], [0], [0], [1], [0, 0, 1, 1], [], []>} : vector<8x8xbf16>, vector<8x8xbf16>, vector<8x8xf32> -> vector<8x8xf32>
    %cst_52 = arith.constant dense<0xFF800000> : vector<8xf32>
    %73 = vector.multi_reduction <maximumf>, %72, %cst_52 [1] : vector<8x8xf32> to vector<8xf32>
    %74 = vector.shape_cast %73 : vector<8xf32> to vector<8x1xf32>
    %75 = vector.broadcast %74 : vector<8x1xf32> to vector<8x8xf32>
    %76 = arith.subf %72, %75 : vector<8x8xf32>
    %77 = math.exp %76 : vector<8x8xf32>
    %cst_53 = arith.constant dense<0.000000e+00> : vector<8xf32>
    %78 = vector.multi_reduction <add>, %77, %cst_53 [1] : vector<8x8xf32> to vector<8xf32>
    %79 = vector.shape_cast %78 : vector<8xf32> to vector<8x1xf32>
    %80 = tpu.reciprocal %79 {approx = true} : vector<8x1xf32> -> vector<8x1xf32>
    %81 = vector.broadcast %80 : vector<8x1xf32> to vector<8x8xf32>
    %82 = arith.mulf %77, %81 : vector<8x8xf32>
    %83 = arith.truncf %82 : vector<8x8xf32> to vector<8x8xbf16>
    %cst_54 = arith.constant dense<0.000000e+00> : vector<8x8xf32>
    %84 = tpu.matmul %83, %70, %cst_54 {dimension_numbers = #tpu.dot_dimension_numbers<[1], [0], [0], [1], [0, 0, 1, 1], [], []>} : vector<8x8xbf16>, vector<8x8xbf16>, vector<8x8xf32> -> vector<8x8xf32>
    %85 = arith.truncf %84 : vector<8x8xf32> to vector<8x8xbf16>
    %c1_55 = arith.constant 1 : index
    %c0_56 = arith.constant 0 : index
    %c0_57 = arith.constant 0 : index
    %86 = vector.load %arg8[%c1_55, %c0_56, %c0_57] : memref<4x8x32xbf16, #tpu.memory_space<vmem>>, vector<1x8x32xbf16>
    %87 = vector.shape_cast %86 : vector<1x8x32xbf16> to vector<8x32xbf16>
    %cst_58 = arith.constant dense<0.000000e+00> : vector<8x32xf32>
    %88 = tpu.matmul %85, %87, %cst_58 {dimension_numbers = #tpu.dot_dimension_numbers<[1], [0], [0], [1], [0, 0, 1, 1], [], []>} : vector<8x8xbf16>, vector<8x32xbf16>, vector<8x32xf32> -> vector<8x32xf32>
    %89 = arith.addf %46, %88 : vector<8x32xf32>
    %c2 = arith.constant 2 : index
    %c0_59 = arith.constant 0 : index
    %c0_60 = arith.constant 0 : index
    %90 = vector.load %arg2[%c2, %c0_59, %c0_60] : memref<4x32x8xbf16, #tpu.memory_space<vmem>>, vector<1x32x8xbf16>
    %91 = vector.shape_cast %90 : vector<1x32x8xbf16> to vector<32x8xbf16>
    %cst_61 = arith.constant dense<0.000000e+00> : vector<8x8xf32>
    %92 = tpu.matmul %2, %91, %cst_61 {dimension_numbers = #tpu.dot_dimension_numbers<[1], [0], [0], [1], [0, 0, 1, 1], [], []>} : vector<8x32xbf16>, vector<32x8xbf16>, vector<8x8xf32> -> vector<8x8xf32>
    %c2_62 = arith.constant 2 : index
    %c0_63 = arith.constant 0 : index
    %c0_64 = arith.constant 0 : index
    %93 = vector.load %arg5[%c2_62, %c0_63, %c0_64] : memref<4x1x8xf32, #tpu.memory_space<vmem>>, vector<1x1x8xf32>
    %94 = vector.shape_cast %93 : vector<1x1x8xf32> to vector<1x8xf32>
    %95 = vector.broadcast %94 : vector<1x8xf32> to vector<8x8xf32>
    %96 = arith.addf %92, %95 : vector<8x8xf32>
    %97 = arith.truncf %96 : vector<8x8xf32> to vector<8x8xbf16>
    %c2_65 = arith.constant 2 : index
    %c0_66 = arith.constant 0 : index
    %c0_67 = arith.constant 0 : index
    %98 = vector.load %arg3[%c2_65, %c0_66, %c0_67] : memref<4x32x8xbf16, #tpu.memory_space<vmem>>, vector<1x32x8xbf16>
    %99 = vector.shape_cast %98 : vector<1x32x8xbf16> to vector<32x8xbf16>
    %cst_68 = arith.constant dense<0.000000e+00> : vector<8x8xf32>
    %100 = tpu.matmul %2, %99, %cst_68 {dimension_numbers = #tpu.dot_dimension_numbers<[1], [0], [0], [1], [0, 0, 1, 1], [], []>} : vector<8x32xbf16>, vector<32x8xbf16>, vector<8x8xf32> -> vector<8x8xf32>
    %c2_69 = arith.constant 2 : index
    %c0_70 = arith.constant 0 : index
    %c0_71 = arith.constant 0 : index
    %101 = vector.load %arg6[%c2_69, %c0_70, %c0_71] : memref<4x1x8xf32, #tpu.memory_space<vmem>>, vector<1x1x8xf32>
    %102 = vector.shape_cast %101 : vector<1x1x8xf32> to vector<1x8xf32>
    %103 = vector.broadcast %102 : vector<1x8xf32> to vector<8x8xf32>
    %104 = arith.addf %100, %103 : vector<8x8xf32>
    %105 = arith.truncf %104 : vector<8x8xf32> to vector<8x8xbf16>
    %c2_72 = arith.constant 2 : index
    %c0_73 = arith.constant 0 : index
    %c0_74 = arith.constant 0 : index
    %106 = vector.load %arg4[%c2_72, %c0_73, %c0_74] : memref<4x32x8xbf16, #tpu.memory_space<vmem>>, vector<1x32x8xbf16>
    %107 = vector.shape_cast %106 : vector<1x32x8xbf16> to vector<32x8xbf16>
    %cst_75 = arith.constant dense<0.000000e+00> : vector<8x8xf32>
    %108 = tpu.matmul %2, %107, %cst_75 {dimension_numbers = #tpu.dot_dimension_numbers<[1], [0], [0], [1], [0, 0, 1, 1], [], []>} : vector<8x32xbf16>, vector<32x8xbf16>, vector<8x8xf32> -> vector<8x8xf32>
    %c2_76 = arith.constant 2 : index
    %c0_77 = arith.constant 0 : index
    %c0_78 = arith.constant 0 : index
    %109 = vector.load %arg7[%c2_76, %c0_77, %c0_78] : memref<4x1x8xf32, #tpu.memory_space<vmem>>, vector<1x1x8xf32>
    %110 = vector.shape_cast %109 : vector<1x1x8xf32> to vector<1x8xf32>
    %111 = vector.broadcast %110 : vector<1x8xf32> to vector<8x8xf32>
    %112 = arith.addf %108, %111 : vector<8x8xf32>
    %113 = arith.truncf %112 : vector<8x8xf32> to vector<8x8xbf16>
    %114 = tpu.transpose %105, [1, 0] : vector<8x8xbf16> -> vector<8x8xbf16>
    %cst_79 = arith.constant dense<0.000000e+00> : vector<8x8xf32>
    %115 = tpu.matmul %97, %114, %cst_79 {dimension_numbers = #tpu.dot_dimension_numbers<[1], [0], [0], [1], [0, 0, 1, 1], [], []>} : vector<8x8xbf16>, vector<8x8xbf16>, vector<8x8xf32> -> vector<8x8xf32>
    %cst_80 = arith.constant dense<0xFF800000> : vector<8xf32>
    %116 = vector.multi_reduction <maximumf>, %115, %cst_80 [1] : vector<8x8xf32> to vector<8xf32>
    %117 = vector.shape_cast %116 : vector<8xf32> to vector<8x1xf32>
    %118 = vector.broadcast %117 : vector<8x1xf32> to vector<8x8xf32>
    %119 = arith.subf %115, %118 : vector<8x8xf32>
    %120 = math.exp %119 : vector<8x8xf32>
    %cst_81 = arith.constant dense<0.000000e+00> : vector<8xf32>
    %121 = vector.multi_reduction <add>, %120, %cst_81 [1] : vector<8x8xf32> to vector<8xf32>
    %122 = vector.shape_cast %121 : vector<8xf32> to vector<8x1xf32>
    %123 = tpu.reciprocal %122 {approx = true} : vector<8x1xf32> -> vector<8x1xf32>
    %124 = vector.broadcast %123 : vector<8x1xf32> to vector<8x8xf32>
    %125 = arith.mulf %120, %124 : vector<8x8xf32>
    %126 = arith.truncf %125 : vector<8x8xf32> to vector<8x8xbf16>
    %cst_82 = arith.constant dense<0.000000e+00> : vector<8x8xf32>
    %127 = tpu.matmul %126, %113, %cst_82 {dimension_numbers = #tpu.dot_dimension_numbers<[1], [0], [0], [1], [0, 0, 1, 1], [], []>} : vector<8x8xbf16>, vector<8x8xbf16>, vector<8x8xf32> -> vector<8x8xf32>
    %128 = arith.truncf %127 : vector<8x8xf32> to vector<8x8xbf16>
    %c2_83 = arith.constant 2 : index
    %c0_84 = arith.constant 0 : index
    %c0_85 = arith.constant 0 : index
    %129 = vector.load %arg8[%c2_83, %c0_84, %c0_85] : memref<4x8x32xbf16, #tpu.memory_space<vmem>>, vector<1x8x32xbf16>
    %130 = vector.shape_cast %129 : vector<1x8x32xbf16> to vector<8x32xbf16>
    %cst_86 = arith.constant dense<0.000000e+00> : vector<8x32xf32>
    %131 = tpu.matmul %128, %130, %cst_86 {dimension_numbers = #tpu.dot_dimension_numbers<[1], [0], [0], [1], [0, 0, 1, 1], [], []>} : vector<8x8xbf16>, vector<8x32xbf16>, vector<8x32xf32> -> vector<8x32xf32>
    %132 = arith.addf %89, %131 : vector<8x32xf32>
    %c3 = arith.constant 3 : index
    %c0_87 = arith.constant 0 : index
    %c0_88 = arith.constant 0 : index
    %133 = vector.load %arg2[%c3, %c0_87, %c0_88] : memref<4x32x8xbf16, #tpu.memory_space<vmem>>, vector<1x32x8xbf16>
    %134 = vector.shape_cast %133 : vector<1x32x8xbf16> to vector<32x8xbf16>
    %cst_89 = arith.constant dense<0.000000e+00> : vector<8x8xf32>
    %135 = tpu.matmul %2, %134, %cst_89 {dimension_numbers = #tpu.dot_dimension_numbers<[1], [0], [0], [1], [0, 0, 1, 1], [], []>} : vector<8x32xbf16>, vector<32x8xbf16>, vector<8x8xf32> -> vector<8x8xf32>
    %c3_90 = arith.constant 3 : index
    %c0_91 = arith.constant 0 : index
    %c0_92 = arith.constant 0 : index
    %136 = vector.load %arg5[%c3_90, %c0_91, %c0_92] : memref<4x1x8xf32, #tpu.memory_space<vmem>>, vector<1x1x8xf32>
    %137 = vector.shape_cast %136 : vector<1x1x8xf32> to vector<1x8xf32>
    %138 = vector.broadcast %137 : vector<1x8xf32> to vector<8x8xf32>
    %139 = arith.addf %135, %138 : vector<8x8xf32>
    %140 = arith.truncf %139 : vector<8x8xf32> to vector<8x8xbf16>
    %c3_93 = arith.constant 3 : index
    %c0_94 = arith.constant 0 : index
    %c0_95 = arith.constant 0 : index
    %141 = vector.load %arg3[%c3_93, %c0_94, %c0_95] : memref<4x32x8xbf16, #tpu.memory_space<vmem>>, vector<1x32x8xbf16>
    %142 = vector.shape_cast %141 : vector<1x32x8xbf16> to vector<32x8xbf16>
    %cst_96 = arith.constant dense<0.000000e+00> : vector<8x8xf32>
    %143 = tpu.matmul %2, %142, %cst_96 {dimension_numbers = #tpu.dot_dimension_numbers<[1], [0], [0], [1], [0, 0, 1, 1], [], []>} : vector<8x32xbf16>, vector<32x8xbf16>, vector<8x8xf32> -> vector<8x8xf32>
    %c3_97 = arith.constant 3 : index
    %c0_98 = arith.constant 0 : index
    %c0_99 = arith.constant 0 : index
    %144 = vector.load %arg6[%c3_97, %c0_98, %c0_99] : memref<4x1x8xf32, #tpu.memory_space<vmem>>, vector<1x1x8xf32>
    %145 = vector.shape_cast %144 : vector<1x1x8xf32> to vector<1x8xf32>
    %146 = vector.broadcast %145 : vector<1x8xf32> to vector<8x8xf32>
    %147 = arith.addf %143, %146 : vector<8x8xf32>
    %148 = arith.truncf %147 : vector<8x8xf32> to vector<8x8xbf16>
    %c3_100 = arith.constant 3 : index
    %c0_101 = arith.constant 0 : index
    %c0_102 = arith.constant 0 : index
    %149 = vector.load %arg4[%c3_100, %c0_101, %c0_102] : memref<4x32x8xbf16, #tpu.memory_space<vmem>>, vector<1x32x8xbf16>
    %150 = vector.shape_cast %149 : vector<1x32x8xbf16> to vector<32x8xbf16>
    %cst_103 = arith.constant dense<0.000000e+00> : vector<8x8xf32>
    %151 = tpu.matmul %2, %150, %cst_103 {dimension_numbers = #tpu.dot_dimension_numbers<[1], [0], [0], [1], [0, 0, 1, 1], [], []>} : vector<8x32xbf16>, vector<32x8xbf16>, vector<8x8xf32> -> vector<8x8xf32>
    %c3_104 = arith.constant 3 : index
    %c0_105 = arith.constant 0 : index
    %c0_106 = arith.constant 0 : index
    %152 = vector.load %arg7[%c3_104, %c0_105, %c0_106] : memref<4x1x8xf32, #tpu.memory_space<vmem>>, vector<1x1x8xf32>
    %153 = vector.shape_cast %152 : vector<1x1x8xf32> to vector<1x8xf32>
    %154 = vector.broadcast %153 : vector<1x8xf32> to vector<8x8xf32>
    %155 = arith.addf %151, %154 : vector<8x8xf32>
    %156 = arith.truncf %155 : vector<8x8xf32> to vector<8x8xbf16>
    %157 = tpu.transpose %148, [1, 0] : vector<8x8xbf16> -> vector<8x8xbf16>
    %cst_107 = arith.constant dense<0.000000e+00> : vector<8x8xf32>
    %158 = tpu.matmul %140, %157, %cst_107 {dimension_numbers = #tpu.dot_dimension_numbers<[1], [0], [0], [1], [0, 0, 1, 1], [], []>} : vector<8x8xbf16>, vector<8x8xbf16>, vector<8x8xf32> -> vector<8x8xf32>
    %cst_108 = arith.constant dense<0xFF800000> : vector<8xf32>
    %159 = vector.multi_reduction <maximumf>, %158, %cst_108 [1] : vector<8x8xf32> to vector<8xf32>
    %160 = vector.shape_cast %159 : vector<8xf32> to vector<8x1xf32>
    %161 = vector.broadcast %160 : vector<8x1xf32> to vector<8x8xf32>
    %162 = arith.subf %158, %161 : vector<8x8xf32>
    %163 = math.exp %162 : vector<8x8xf32>
    %cst_109 = arith.constant dense<0.000000e+00> : vector<8xf32>
    %164 = vector.multi_reduction <add>, %163, %cst_109 [1] : vector<8x8xf32> to vector<8xf32>
    %165 = vector.shape_cast %164 : vector<8xf32> to vector<8x1xf32>
    %166 = tpu.reciprocal %165 {approx = true} : vector<8x1xf32> -> vector<8x1xf32>
    %167 = vector.broadcast %166 : vector<8x1xf32> to vector<8x8xf32>
    %168 = arith.mulf %163, %167 : vector<8x8xf32>
    %169 = arith.truncf %168 : vector<8x8xf32> to vector<8x8xbf16>
    %cst_110 = arith.constant dense<0.000000e+00> : vector<8x8xf32>
    %170 = tpu.matmul %169, %156, %cst_110 {dimension_numbers = #tpu.dot_dimension_numbers<[1], [0], [0], [1], [0, 0, 1, 1], [], []>} : vector<8x8xbf16>, vector<8x8xbf16>, vector<8x8xf32> -> vector<8x8xf32>
    %171 = arith.truncf %170 : vector<8x8xf32> to vector<8x8xbf16>
    %c3_111 = arith.constant 3 : index
    %c0_112 = arith.constant 0 : index
    %c0_113 = arith.constant 0 : index
    %172 = vector.load %arg8[%c3_111, %c0_112, %c0_113] : memref<4x8x32xbf16, #tpu.memory_space<vmem>>, vector<1x8x32xbf16>
    %173 = vector.shape_cast %172 : vector<1x8x32xbf16> to vector<8x32xbf16>
    %cst_114 = arith.constant dense<0.000000e+00> : vector<8x32xf32>
    %174 = tpu.matmul %171, %173, %cst_114 {dimension_numbers = #tpu.dot_dimension_numbers<[1], [0], [0], [1], [0, 0, 1, 1], [], []>} : vector<8x8xbf16>, vector<8x32xbf16>, vector<8x32xf32> -> vector<8x32xf32>
    %175 = arith.addf %132, %174 : vector<8x32xf32>
    %c0_115 = arith.constant 0 : index
    %c0_116 = arith.constant 0 : index
    %176 = vector.load %arg9[%c0_115, %c0_116] : memref<1x32xf32, #tpu.memory_space<vmem>>, vector<1x32xf32>
    %177 = vector.broadcast %176 : vector<1x32xf32> to vector<8x32xf32>
    %178 = arith.addf %175, %177 : vector<8x32xf32>
    %179 = arith.addf %1, %178 : vector<8x32xf32>
    %c0_117 = arith.constant 0 : index
    %c0_118 = arith.constant 0 : index
    %180 = vector.load %arg10[%c0_117, %c0_118] : memref<1x32xf32, #tpu.memory_space<vmem>>, vector<1x32xf32>
    %c0_119 = arith.constant 0 : index
    %c0_120 = arith.constant 0 : index
    %181 = vector.load %arg11[%c0_119, %c0_120] : memref<1x32xf32, #tpu.memory_space<vmem>>, vector<1x32xf32>
    %cst_121 = arith.constant dense<0.000000e+00> : vector<8xf32>
    %182 = vector.multi_reduction <add>, %179, %cst_121 [1] : vector<8x32xf32> to vector<8xf32>
    %183 = vector.shape_cast %182 : vector<8xf32> to vector<8x1xf32>
    %cst_122 = arith.constant 3.200000e+01 : f32
    %184 = vector.broadcast %cst_122 : f32 to vector<8x1xf32>
    %185 = arith.divf %183, %184 : vector<8x1xf32>
    %186 = vector.broadcast %185 : vector<8x1xf32> to vector<8x32xf32>
    %187 = arith.subf %179, %186 : vector<8x32xf32>
    %188 = arith.mulf %187, %187 : vector<8x32xf32>
    %cst_123 = arith.constant dense<0.000000e+00> : vector<8xf32>
    %189 = vector.multi_reduction <add>, %188, %cst_123 [1] : vector<8x32xf32> to vector<8xf32>
    %190 = vector.shape_cast %189 : vector<8xf32> to vector<8x1xf32>
    %cst_124 = arith.constant 3.200000e+01 : f32
    %191 = vector.broadcast %cst_124 : f32 to vector<8x1xf32>
    %192 = arith.divf %190, %191 : vector<8x1xf32>
    %193 = vector.broadcast %185 : vector<8x1xf32> to vector<8x32xf32>
    %194 = arith.subf %179, %193 : vector<8x32xf32>
    %cst_125 = arith.constant 9.99999974E-6 : f32
    %195 = vector.broadcast %cst_125 : f32 to vector<8x1xf32>
    %196 = arith.addf %192, %195 : vector<8x1xf32>
    %197 = math.rsqrt %196 : vector<8x1xf32>
    %198 = vector.broadcast %197 : vector<8x1xf32> to vector<8x32xf32>
    %199 = arith.mulf %194, %198 : vector<8x32xf32>
    %200 = vector.broadcast %180 : vector<1x32xf32> to vector<8x32xf32>
    %201 = arith.mulf %199, %200 : vector<8x32xf32>
    %202 = vector.broadcast %181 : vector<1x32xf32> to vector<8x32xf32>
    %203 = arith.addf %201, %202 : vector<8x32xf32>
    %204 = arith.truncf %203 : vector<8x32xf32> to vector<8x32xbf16>
    %c0_126 = arith.constant 0 : index
    %c0_127 = arith.constant 0 : index
    %205 = vector.load %arg12[%c0_126, %c0_127] : memref<32x64xbf16, #tpu.memory_space<vmem>>, vector<32x64xbf16>
    %cst_128 = arith.constant dense<0.000000e+00> : vector<8x64xf32>
    %206 = tpu.matmul %204, %205, %cst_128 {dimension_numbers = #tpu.dot_dimension_numbers<[1], [0], [0], [1], [0, 0, 1, 1], [], []>} : vector<8x32xbf16>, vector<32x64xbf16>, vector<8x64xf32> -> vector<8x64xf32>
    %c0_129 = arith.constant 0 : index
    %c0_130 = arith.constant 0 : index
    %207 = vector.load %arg13[%c0_129, %c0_130] : memref<1x64xf32, #tpu.memory_space<vmem>>, vector<1x64xf32>
    %208 = vector.broadcast %207 : vector<1x64xf32> to vector<8x64xf32>
    %209 = arith.addf %206, %208 : vector<8x64xf32>
    %cst_131 = arith.constant 0.000000e+00 : f32
    %210 = vector.broadcast %cst_131 : f32 to vector<8x64xf32>
    %211 = arith.maximumf %209, %210 : vector<8x64xf32>
    %212 = arith.truncf %211 : vector<8x64xf32> to vector<8x64xbf16>
    %c0_132 = arith.constant 0 : index
    %c0_133 = arith.constant 0 : index
    %213 = vector.load %arg14[%c0_132, %c0_133] : memref<64x32xbf16, #tpu.memory_space<vmem>>, vector<64x32xbf16>
    %cst_134 = arith.constant dense<0.000000e+00> : vector<8x32xf32>
    %214 = tpu.matmul %212, %213, %cst_134 {dimension_numbers = #tpu.dot_dimension_numbers<[1], [0], [0], [1], [0, 0, 1, 1], [], []>} : vector<8x64xbf16>, vector<64x32xbf16>, vector<8x32xf32> -> vector<8x32xf32>
    %c0_135 = arith.constant 0 : index
    %c0_136 = arith.constant 0 : index
    %215 = vector.load %arg15[%c0_135, %c0_136] : memref<1x32xf32, #tpu.memory_space<vmem>>, vector<1x32xf32>
    %216 = vector.broadcast %215 : vector<1x32xf32> to vector<8x32xf32>
    %217 = arith.addf %214, %216 : vector<8x32xf32>
    %218 = arith.addf %203, %217 : vector<8x32xf32>
    %c0_137 = arith.constant 0 : index
    %c0_138 = arith.constant 0 : index
    %219 = vector.load %arg16[%c0_137, %c0_138] : memref<1x32xf32, #tpu.memory_space<vmem>>, vector<1x32xf32>
    %c0_139 = arith.constant 0 : index
    %c0_140 = arith.constant 0 : index
    %220 = vector.load %arg17[%c0_139, %c0_140] : memref<1x32xf32, #tpu.memory_space<vmem>>, vector<1x32xf32>
    %cst_141 = arith.constant dense<0.000000e+00> : vector<8xf32>
    %221 = vector.multi_reduction <add>, %218, %cst_141 [1] : vector<8x32xf32> to vector<8xf32>
    %222 = vector.shape_cast %221 : vector<8xf32> to vector<8x1xf32>
    %cst_142 = arith.constant 3.200000e+01 : f32
    %223 = vector.broadcast %cst_142 : f32 to vector<8x1xf32>
    %224 = arith.divf %222, %223 : vector<8x1xf32>
    %225 = vector.broadcast %224 : vector<8x1xf32> to vector<8x32xf32>
    %226 = arith.subf %218, %225 : vector<8x32xf32>
    %227 = arith.mulf %226, %226 : vector<8x32xf32>
    %cst_143 = arith.constant dense<0.000000e+00> : vector<8xf32>
    %228 = vector.multi_reduction <add>, %227, %cst_143 [1] : vector<8x32xf32> to vector<8xf32>
    %229 = vector.shape_cast %228 : vector<8xf32> to vector<8x1xf32>
    %cst_144 = arith.constant 3.200000e+01 : f32
    %230 = vector.broadcast %cst_144 : f32 to vector<8x1xf32>
    %231 = arith.divf %229, %230 : vector<8x1xf32>
    %232 = vector.broadcast %224 : vector<8x1xf32> to vector<8x32xf32>
    %233 = arith.subf %218, %232 : vector<8x32xf32>
    %cst_145 = arith.constant 9.99999974E-6 : f32
    %234 = vector.broadcast %cst_145 : f32 to vector<8x1xf32>
    %235 = arith.addf %231, %234 : vector<8x1xf32>
    %236 = math.rsqrt %235 : vector<8x1xf32>
    %237 = vector.broadcast %236 : vector<8x1xf32> to vector<8x32xf32>
    %238 = arith.mulf %233, %237 : vector<8x32xf32>
    %239 = vector.broadcast %219 : vector<1x32xf32> to vector<8x32xf32>
    %240 = arith.mulf %238, %239 : vector<8x32xf32>
    %241 = vector.broadcast %220 : vector<1x32xf32> to vector<8x32xf32>
    %242 = arith.addf %240, %241 : vector<8x32xf32>
    %243 = vector.shape_cast %242 : vector<8x32xf32> to vector<1x8x32xf32>
    %c0_146 = arith.constant 0 : index
    %c0_147 = arith.constant 0 : index
    %c0_148 = arith.constant 0 : index
    %244 = vector.load %arg18[%c0_146, %c0_147, %c0_148] : memref<1x8x32xf32, #tpu.memory_space<vmem>>, vector<1x8x32xf32>
    tpu.vector_store %arg18[%c0_146, %c0_147, %c0_148], %243 {strides = array<i32>} : memref<1x8x32xf32, #tpu.memory_space<vmem>>, vector<1x8x32xf32>,
    return
  }
  func.func @transform_0(%arg0: i32) -> (i32, i32, i32) {
    %c0_i32 = arith.constant 0 : i32
    %c0_i32_0 = arith.constant 0 : i32
    %c0_i32_1 = arith.constant 0 : i32
    return %arg0, %c0_i32, %c0_i32_0 : i32, i32, i32
  }
  func.func @transform_1(%arg0: i32) -> (i32, i32, i32) {
    %c0_i32 = arith.constant 0 : i32
    %c0_i32_0 = arith.constant 0 : i32
    %c0_i32_1 = arith.constant 0 : i32
    %c0_i32_2 = arith.constant 0 : i32
    return %c0_i32, %c0_i32_0, %c0_i32_1 : i32, i32, i32
  }
  func.func @transform_2(%arg0: i32) -> (i32, i32, i32) {
    %c0_i32 = arith.constant 0 : i32
    %c0_i32_0 = arith.constant 0 : i32
    %c0_i32_1 = arith.constant 0 : i32
    %c0_i32_2 = arith.constant 0 : i32
    return %c0_i32, %c0_i32_0, %c0_i32_1 : i32, i32, i32
  }
  func.func @transform_3(%arg0: i32) -> (i32, i32, i32) {
    %c0_i32 = arith.constant 0 : i32
    %c0_i32_0 = arith.constant 0 : i32
    %c0_i32_1 = arith.constant 0 : i32
    %c0_i32_2 = arith.constant 0 : i32
    return %c0_i32, %c0_i32_0, %c0_i32_1 : i32, i32, i32
  }
  func.func @transform_4(%arg0: i32) -> (i32, i32, i32) {
    %c0_i32 = arith.constant 0 : i32
    %c0_i32_0 = arith.constant 0 : i32
    %c0_i32_1 = arith.constant 0 : i32
    %c0_i32_2 = arith.constant 0 : i32
    return %c0_i32, %c0_i32_0, %c0_i32_1 : i32, i32, i32
  }
  func.func @transform_5(%arg0: i32) -> (i32, i32, i32) {
    %c0_i32 = arith.constant 0 : i32
    %c0_i32_0 = arith.constant 0 : i32
    %c0_i32_1 = arith.constant 0 : i32
    %c0_i32_2 = arith.constant 0 : i32
    return %c0_i32, %c0_i32_0, %c0_i32_1 : i32, i32, i32
  }
  func.func @transform_6(%arg0: i32) -> (i32, i32, i32) {
    %c0_i32 = arith.constant 0 : i32
    %c0_i32_0 = arith.constant 0 : i32
    %c0_i32_1 = arith.constant 0 : i32
    %c0_i32_2 = arith.constant 0 : i32
    return %c0_i32, %c0_i32_0, %c0_i32_1 : i32, i32, i32
  }
  func.func @transform_7(%arg0: i32) -> (i32, i32, i32) {
    %c0_i32 = arith.constant 0 : i32
    %c0_i32_0 = arith.constant 0 : i32
    %c0_i32_1 = arith.constant 0 : i32
    %c0_i32_2 = arith.constant 0 : i32
    return %c0_i32, %c0_i32_0, %c0_i32_1 : i32, i32, i32
  }
  func.func @transform_8(%arg0: i32) -> (i32, i32) {
    %c0_i32 = arith.constant 0 : i32
    %c0_i32_0 = arith.constant 0 : i32
    %c0_i32_1 = arith.constant 0 : i32
    return %c0_i32, %c0_i32_0 : i32, i32
  }
  func.func @transform_9(%arg0: i32) -> (i32, i32) {
    %c0_i32 = arith.constant 0 : i32
    %c0_i32_0 = arith.constant 0 : i32
    %c0_i32_1 = arith.constant 0 : i32
    return %c0_i32, %c0_i32_0 : i32, i32
  }
  func.func @transform_10(%arg0: i32) -> (i32, i32) {
    %c0_i32 = arith.constant 0 : i32
    %c0_i32_0 = arith.constant 0 : i32
    %c0_i32_1 = arith.constant 0 : i32
    return %c0_i32, %c0_i32_0 : i32, i32
  }
  func.func @transform_11(%arg0: i32) -> (i32, i32) {
    %c0_i32 = arith.constant 0 : i32
    %c0_i32_0 = arith.constant 0 : i32
    %c0_i32_1 = arith.constant 0 : i32
    return %c0_i32, %c0_i32_0 : i32, i32
  }
  func.func @transform_12(%arg0: i32) -> (i32, i32) {
    %c0_i32 = arith.constant 0 : i32
    %c0_i32_0 = arith.constant 0 : i32
    %c0_i32_1 = arith.constant 0 : i32
    return %c0_i32, %c0_i32_0 : i32, i32
  }
  func.func @transform_13(%arg0: i32) -> (i32, i32) {
    %c0_i32 = arith.constant 0 : i32
    %c0_i32_0 = arith.constant 0 : i32
    %c0_i32_1 = arith.constant 0 : i32
    return %c0_i32, %c0_i32_0 : i32, i32
  }
  func.func @transform_14(%arg0: i32) -> (i32, i32) {
    %c0_i32 = arith.constant 0 : i32
    %c0_i32_0 = arith.constant 0 : i32
    %c0_i32_1 = arith.constant 0 : i32
    return %c0_i32, %c0_i32_0 : i32, i32
  }
  func.func @transform_15(%arg0: i32) -> (i32, i32) {
    %c0_i32 = arith.constant 0 : i32
    %c0_i32_0 = arith.constant 0 : i32
    %c0_i32_1 = arith.constant 0 : i32
    return %c0_i32, %c0_i32_0 : i32, i32
  }
  func.func @transform_16(%arg0: i32) -> (i32, i32) {
    %c0_i32 = arith.constant 0 : i32
    %c0_i32_0 = arith.constant 0 : i32
    %c0_i32_1 = arith.constant 0 : i32
    return %c0_i32, %c0_i32_0 : i32, i32
  }
  func.func @transform_17(%arg0: i32) -> (i32, i32, i32) {
    %c0_i32 = arith.constant 0 : i32
    %c0_i32_0 = arith.constant 0 : i32
    %c0_i32_1 = arith.constant 0 : i32
    return %arg0, %c0_i32, %c0_i32_0 : i32, i32, i32
  }
}

</mosaic_0001>

<bundles_post_ra>
// kernel: tpu_custom_call.1
= control target key start
LH: loop header
LB: loop body
LE: loop exit
PB: predicated region body
PF: predicated region fallthrough
CT: control target
= control target key end

     0   :  { %s2303_s0 = inlined_call_operand.vmem [shape: f32[2,8,32], index: 0, kind: input, shape index: {}]   ;;  %s2304_s1 = inlined_call_operand.vmem [shape: bf16[4,32,8], index: 1, kind: input, shape index: {}]   ;;  %s2305_s2 = inlined_call_operand.vmem [shape: bf16[4,32,8], index: 2, kind: input, shape index: {}]   ;;  %s2306_s3 = inlined_call_operand.vmem [shape: bf16[4,32,8], index: 3, kind: input, shape index: {}]   ;;  %s2307_s4 = inlined_call_operand.vmem [shape: f32[4,1,8], index: 4, kind: input, shape index: {}]   ;;  %s2308_s5 = inlined_call_operand.vmem [shape: f32[4,1,8], index: 5, kind: input, shape index: {}]   ;;  %s2309_s6 = inlined_call_operand.vmem [shape: f32[4,1,8], index: 6, kind: input, shape index: {}]   ;;  %s2310_s7 = inlined_call_operand.vmem [shape: bf16[4,8,32], index: 7, kind: input, shape index: {}]   ;;  %s2311_s8 = inlined_call_operand.vmem [shape: f32[1,32], index: 8, kind: input, shape index: {}]   ;;  %s2312_s9 = inlined_call_operand.vmem [shape: f32[1,32], index: 9, kind: input, shape index: {}]   ;;  %s2313_s10 = inlined_call_operand.vmem [shape: f32[1,32], index: 10, kind: input, shape index: {}]   ;;  %s2314_s11 = inlined_call_operand.vmem [shape: bf16[32,64], index: 11, kind: input, shape index: {}]   ;;  %s2315_s12 = inlined_call_operand.vmem [shape: f32[1,64], index: 12, kind: input, shape index: {}]   ;;  %s2316_s13 = inlined_call_operand.vmem [shape: bf16[64,32], index: 13, kind: input, shape index: {}]   ;;  %s2317_s14 = inlined_call_operand.vmem [shape: f32[1,32], index: 14, kind: input, shape index: {}]   ;;  %s2318_s15 = inlined_call_operand.vmem [shape: f32[1,32], index: 15, kind: input, shape index: {}]   ;;  %s2319_s16 = inlined_call_operand.vmem [shape: f32[1,32], index: 16, kind: input, shape index: {}]   ;;  %s2320_s17 = inlined_call_operand.hbm [shape: f32[2,8,32], index: 17, kind: output, shape index: {}]  }
   0x1   :  { %2328 = sst [smem:[#allocation11_spill]] %s2303_s0 }
   0x2   :  { %2329 = sst [smem:[#allocation12_spill]] %s2304_s1 }
   0x3   :  { %2330 = sst [smem:[#allocation13_spill]] %s2305_s2 }
   0x4   :  { %2331 = sst [smem:[#allocation14_spill]] %s2319_s16 }
   0x5   :  { %22 = vsyncpa [#allocation3], 0 }
   0x6   :  { %24 = vsyncpa [#allocation3 + $0x1], 0  ;;  %s1984_s24 = smov 0   ;;  %s1986_s25 = smov 0  }
   0x7   :  { %s1988_s26 = smov 0   ;;  %s1990_s27 = smov 0  }
   0x8 LB: > { %2332 = sst [smem:[#allocation5_spill]] %s1879_s24  ;;  %s2005_s28 = sadd.s32 4294967295, %s1891_s27   ;;  %s1891_s27 = sphi %s1990_s27, %s2347_s27   ;;  %s1887_s26 = sphi %s1988_s26, %s2352_s26   ;;  %s1883_s25 = sphi %s1986_s25, %s2351_s25   ;;  %s1879_s24 = sphi %s1984_s24, %s2350_s24  }
   0x9   : > { %2333 = sst [smem:[#allocation6_spill]] %s1887_s26  ;;  %s1514_s29 = sadd.s32 4294967294, %s1891_s27  }
   0xa   : > { %2334 = sst [smem:[#allocation7_spill]] %s1891_s27  ;;  %s2009_s0 = sadd.s32 1, %s1891_s27  }
   0xb   : > { %2335 = sst [smem:[#allocation8_spill]] %s2009_s0  ;;  %s399_s30 = sadd.s32 1, %s1887_s26 }
   0xc   : > { %s396_s18 = ssub.s32 %s1891_s27, %s2009_s0  ;;  %p409_p0 = scmp.ne.s32.totalorder %s1887_s26, %s1883_s25 }
   0xd   : > { %p397_p1 = scmp.eq.s32.totalorder %s396_s18, 0  ;;  %p410_p2 = scmp.eq.s32.totalorder %s2005_s28, 1 }
   0xe   : > { %p415_p3 = scmp.ne.s32.totalorder %s1883_s25, %s1879_s24  ;;  %p416_p4 = scmp.eq.s32.totalorder %s1514_s29, 1 }
   0xf   : > { %s2020_s19 = scalar_select %p397_p1, %s1887_s26, %s399_s30  }
  0x10   : > { %p2022_p5 = por %p410_p2, %p409_p0  ;;  %p2026_p6 = por %p416_p4, %p415_p3 }
  0x11   : > { %2336 = sst [smem:[#allocation9_spill]] %s2020_s19  ;;  %p1517_p7 = scmp.ge.s32.totalorder %s1891_s27, 1 }
  0x12   : > { %s2338_s20 = scalar_select %p2026_p6, 1, 0 }
  0x13   : > { %p489_p8 = scmp.lt.s32.totalorder %s1891_s27, 3 }
  0x14   : > { %2339 = sst [smem:[#allocation10_spill]] %s2338_s20 }
  0x15   : > { %p490_p9 = pnand %p1517_p7, %p489_p8 }
  0x16   : > { %s2340_s23 = sld [smem:[#allocation12_spill]] (!%p490_p9)  ;;  %p540_p10 = scmp.lt.s32.totalorder (!%p490_p9), %s2005_s28, 1 }
  0x17   : > { %493 = sbr.rel (%p490_p9) target bundleno = 3104 (0xc20), region = 88  ;;  %s2341_s2 = sld [smem:[#allocation13_spill]] (!%p490_p9) }
  0x18   : > { %s2342_s27 = sld [smem:[#allocation11_spill]] (!%p490_p9)  ;;  %s1715_s26 = sshll.u32 (!%p490_p9), %s2005_s28, 3 }
  0x19   : > { %s1450_s19 = scalar_lea.hbm (!%p490_p9), %s2320_s17, %s1715_s26  ;;  %s2343_s30 = sld [smem:[#allocation14_spill]] (!%p490_p9) }
  0x1c   : > { %v1719_v0 = vld [vmem:[%s2340_s23 + $0x8] sm:$0xff]  ;;  %v1718_v2 = vld [vmem:[%s2340_s23] sm:$0xff]  ;;  %s541_s20 = scalar_select %p540_p10, %s2005_s28, 1  ;;  %vm567_vm0 = vcmask 261120   ;;  %vm653_vm1 = vcmask 64512   ;;  %v1725_v24 = vld [vmem:[%s2340_s23 + $0x18] sm:$0xff] }
  0x1d   : > { %v1721_v1 = vld [vmem:[%s2341_s2 + $0x8] sm:$0xff]  ;;  %577 = vmatpush.bf16.msra.mxu0 %v1719_v0  ;;  %v1720_v3 = vld [vmem:[%s2341_s2] sm:$0xff]  ;;  %v1727_v19 = vld [vmem:[%s2341_s2 + $0x18] sm:$0xff]  ;;  %vm688_vm2 = vcmask 1043456   ;;  %vm1388_vm7 = vcmask 523264  }
  0x1e   : > { %611 = vmatpush.bf16.msra.mxu1 %v1721_v1  ;;  %s1519_s21 = sshll.u32 %s541_s20, 3  ;;  %v1789_v6 = vld [vmem:[%s2308_s5] ss:$0 sm:$0xff]  ;;  %v1723_v17 = vld [vmem:[%s2306_s3 + $0x8] sm:$0xff]  ;;  %v1726_v23 = vld [vmem:[%s2341_s2 + $0x10] sm:$0xff] }
  0x1f   : > { %s543_s16 = scalar_lea.vmem %s2342_s27, %s1519_s21  ;;  %v1788_v9 = vld [vmem:[%s2307_s4] ss:$0 sm:$0xff]  ;;  %645 = vmatpush.bf16.msra.mxu2 %v1723_v17  ;;  %v1724_v25 = vld [vmem:[%s2340_s23 + $0x10] sm:$0xff]  ;;  %v1791_v38 = vld [vmem:[%s2308_s5 + $0x1] ss:$0 sm:$0xff]  ;;  %s537_s21 = sand.u32 1, %s1883_s25  }
  0x20   : > { %v2049_v4 = vld [vmem:[%s543_s16] sm:$0xff]  ;;  %v1729_v45 = vld [vmem:[%s2306_s3 + $0x18] sm:$0xff]  ;;  %v1728_v46 = vld [vmem:[%s2306_s3 + $0x10] sm:$0xff]  ;;  %s1518_s22 = sshll.u32 %s537_s21, 3  ;;  %s1440_s0 = scalar_lea.sflag [#allocation3], %s537_s21 }
  0x21   : > { %578 = vmatpush.bf16.msra.mxu0 %v1718_v2  ;;  %v2053_v5 = vpack.c.bf16 %v2049_v4, %v2049_v4  ;;  %v1722_v18 = vld [vmem:[%s2306_s3] sm:$0xff]  ;;  %s539_s18 = scalar_lea.vmem [#allocation2], %s1518_s22  ;;  %s1849_s22 = scalar_lea.hbm %s2320_s17, 16 }
  0x22   : > { %612 = vmatpush.bf16.msra.mxu1 %v1720_v3  ;;  %v1790_v33 = vld [vmem:[%s2309_s6] ss:$0 sm:$0xff]  ;;  %v1792_v51 = vld [vmem:[%s2307_s4 + $0x1] ss:$0 sm:$0xff]  ;;  %s1452_s28 = sshll.u32 %s539_s18, 4  ;;  %s1453_s28 = int_to_ptr.vmem [resolvable:$true] %s1452_s28 }
  0x23   : > { %646 = vmatpush.bf16.msra.mxu2 %v1722_v18  ;;  %v706_v54 = vld [vmem:[%s2310_s7] sm:$0xf] }
  0x24   : > { %1528 = vmatmul.msk.bf16.vlgmr.msra.gmra.mxu0 %vm567_vm0, %v2053_v5  ;;  %v891_v55 = vsel %vm688_vm2, %v706_v54, 0  ;;  %v1793_v56 = vld [vmem:[%s2309_s6 + $0x1] ss:$0 sm:$0xff] }
  0x25   : > { %1537 = vmatmul.msk.bf16.vlgmr.msra.gmra.mxu1 %vm567_vm0, %v2053_v5 }
  0x26   : > { %1546 = vmatmul.msk.bf16.vlgmr.msra.gmra.mxu2 %vm567_vm0, %v2053_v5  ;;  %735 = vmatpush.bf16.msrb.mxu1 %v1725_v24 }
  0x27   : > { %771 = vmatpush.bf16.msrb.mxu2 %v1727_v19 }
  0x2a   : > { %736 = vmatpush.bf16.msrb.mxu1 %v1724_v25 }
  0x2b   : > { %772 = vmatpush.bf16.msrb.mxu2 %v1726_v23 }
  0x35   : > { %1562 = vmatmul.msk.bf16.vlgmr.msrb.gmra.mxu1 %vm567_vm0, %v2053_v5 }
  0x36   : > { %1576 = vmatmul.msk.bf16.vlgmr.msrb.gmra.mxu2 %vm567_vm0, %v2053_v5 }
  0xa1   : > { %v580_v7 = vpop.f32.mrf.mxu0 }
  0xa2   : > { %v614_v8 = vpop.f32.mrf.mxu1  ;;  %v581_v12 = vadd.f32 %v1788_v9, %v580_v7 }
  0xa3   : > { %v615_v10 = vadd.f32 %v1789_v6, %v614_v8 }
  0xa4   : > { %v584_v16 = vpack.c.bf16 %v581_v12, %v581_v12 }
  0xa5   : > { %v618_v11 = vpack.c.bf16 %v615_v10, %v615_v10 }
  0xa7   : > { %v658_v13 = vsel %vm653_vm1, %v618_v11, 0 }
  0xa8   : > { %667 = vmatpush.bf16.xpose.msra.mxu3 %v658_v13  ;;  %v1733_v13 = vld [vmem:[%s2341_s2 + $0x28] sm:$0xff] }
  0xa9   : > { %v582_v14 = vpop.f32.mrf.mxu0  ;;  %v648_v26 = vpop.f32.mrf.mxu2 }
  0xaa   : > { %v616_v15 = vpop.f32.mrf.mxu1  ;;  %v649_v34 = vadd.f32 %v1790_v33, %v648_v26  ;;  %v1732_v14 = vld [vmem:[%s2341_s2 + $0x20] sm:$0xff] }
  0xab   : > { %v1731_v15 = vld [vmem:[%s2340_s23 + $0x28] sm:$0xff] }
  0xac   : > { %v652_v35 = vpack.c.bf16 %v649_v34, %v649_v34 }
  0xae   : > { %v690_v36 = vsel %vm688_vm2, %v652_v35, 0 }
  0xaf   : > { %1547 = vmatmul.msk.bf16.vlgmr.msra.gmra.mxu3 %vm653_vm1, %v584_v16  ;;  %699 = vmatpush.bf16.msrb.mxu0 %v690_v36  ;;  %v1730_v16 = vld [vmem:[%s2340_s23 + $0x20] sm:$0xff] }
  0xb0   : > { %807 = vmatpush.bf16.msrb.mxu3 %v1729_v45  ;;  %v1796_v45 = vld [vmem:[%s2309_s6 + $0x2] ss:$0 sm:$0xff] }
  0xb1   : > { %v650_v30 = vpop.f32.mrf.mxu2 }
  0xb2   : > { %v738_v42 = vpop.f32.mrf.mxu1 }
  0xb3   : > { %v739_v52 = vadd.f32 %v1792_v51, %v738_v42 }
  0xb4   : > { %808 = vmatpush.bf16.msrb.mxu3 %v1728_v46 }
  0xb5   : > { %v742_v53 = vpack.c.bf16 %v739_v52, %v739_v52 }
  0xb8   : > { %900 = vmatpush.bf16.msra.mxu3 %v891_v55 }
  0xb9   : > { %v774_v37 = vpop.f32.mrf.mxu2 }
  0xba   : > { %v775_v39 = vadd.f32 %v1791_v38, %v774_v37  ;;  %v740_v44 = vpop.f32.mrf.mxu1  ;;  %v1735_v38 = vld [vmem:[%s2306_s3 + $0x28] sm:$0xff] }
  0xbb   : > { %v1739_v44 = vld [vmem:[%s2341_s2 + $0x38] sm:$0xff] }
  0xbc   : > { %v778_v40 = vpack.c.bf16 %v775_v39, %v775_v39  ;;  %v1734_v39 = vld [vmem:[%s2306_s3 + $0x20] sm:$0xff] }
  0xbe   : > { %v819_v41 = vsel %vm653_vm1, %v778_v40, 0 }
  0xbf   : > { %828 = vmatpush.bf16.xpose.msra.mxu0 %v819_v41  ;;  %1590 = vmatmul.msk.bf16.vlgmr.msrb.gmra.mxu3 %vm567_vm0, %v2053_v5 }
  0xc1   : > { %v776_v43 = vpop.f32.mrf.mxu2 }
 0x132   : > { %v669_v20 = vpop.f32.mrf.mxu3 }
 0x133   : > { %v673_v21 = vsel %vm653_vm1, %v669_v20, -inf }
 0x134   : > { %674 = vmax.xlane.f32.xlu0 %v673_v21  ;;  %v1593_v21 = vld [vmem:[%s2310_s7 + $0x4] sm:$0xf] }
 0x13a   : > { %v671_v22 = vpop.f32.mrf.mxu3 }
 0x13b   : > { %v872_v22 = vsel %vm688_vm2, %v1593_v21, 0 }
 0x13c   : > { %881 = vmatpush.bf16.msra.mxu2 %v872_v22 }
 0x140   : > { %1006 = vmatpush.bf16.msrb.mxu2 %v1735_v38 }
 0x142   : > { %v810_v57 = vpop.f32.mrf.mxu3 }
 0x143   : > { %v811_v59 = vadd.f32 %v1793_v56, %v810_v57  ;;  %v1738_v56 = vld [vmem:[%s2341_s2 + $0x30] sm:$0xff]  ;;  %v1737_v57 = vld [vmem:[%s2340_s23 + $0x38] sm:$0xff]  ;;  %s1454_s2 = sshll.u32 %s1450_s19, 4  ;;  %s1455_s2 = int_to_ptr.hbm [resolvable:$true] %s1454_s2 }
 0x144   : > { %1007 = vmatpush.bf16.msrb.mxu2 %v1734_v39  ;;  %s1843_s24 = sshra.s32 %s1455_s2, 4  ;;  %s1844_s24 = int_to_ptr.hbm [resolvable:$true] %s1843_s24 }
 0x145   : > { %v814_v61 = vpack.c.bf16 %v811_v59, %v811_v59  ;;  %v1640_v59 = vld [vmem:[%s2310_s7 + $0x8] sm:$0xf]  ;;  %s1845_s26 = scalar_lea.hbm %s1844_s24, 8  ;;  %p1850_p0 = scmp.lt.s32.totalorder %s1844_s24, %s2320_s17 }
 0x146   : > { %p1846_p11 = scmp.ne.s32.totalorder %s1844_s24, %s1845_s26  ;;  %p1851_p1 = scmp.lt.s32.totalorder %s1849_s22, %s1845_s26 }
 0x147   : > { %v850_v62 = vsel %vm688_vm2, %v814_v61, 0 }
 0x148   : > { %859 = vmatpush.bf16.msra.mxu1 %v850_v62  ;;  %p1847_p12 = pnand %p1846_p11, %p2022_p5  ;;  %p1852_p2 = por %p1851_p1, %p1850_p0 }
 0x14a   : > { %v812_v63 = vpop.f32.mrf.mxu3  ;;  %p1848_p13 = pneg %p1847_p12 }
 0x14c   : > { %970 = vmatpush.bf16.msrb.mxu1 %v1733_v13  ;;  %p1853_p3 = pnand %p1852_p2, %p1848_p13 }
 0x150   : > { %971 = vmatpush.bf16.msrb.mxu1 %v1732_v14  ;;  %v1798_v14 = vld [vmem:[%s2307_s4 + $0x3] ss:$0 sm:$0xff] }
 0x1a7   : > { %v675_v27 = vpop.xlane.xlu0 %674 }
 0x1a8   : > { %v676_v28 = vsub.f32 %v669_v20, %v675_v27 }
 0x1aa   : > { %v677_v29 = vmul.f32 1.442695, %v676_v28  ;;  %v1794_v28 = vld [vmem:[%s2308_s5 + $0x2] ss:$0 sm:$0xff] }
 0x1ac   : > { %1807 = vpow2.f32 %v677_v29 }
 0x1b2   : > { %v1808_v31 = vpop.eup %1807 }
 0x1b3   : > { %v679_v32 = vsel %vm653_vm1, %v1808_v31, 0.0 }
 0x1b4   : > { %680 = vadd.xlane.f32.xlu0 %v679_v32 }
 0x227   : > { %v681_v47 = vpop.xlane.xlu0 %680 }
 0x228   : > { %1809 = vrcp.f32 %v681_v47 }
 0x22e   : > { %v1810_v48 = vpop.eup %1809 }
 0x22f   : > { %v683_v49 = vmul.f32 %v1810_v48, %v1808_v31  ;;  %v1795_v31 = vld [vmem:[%s2307_s4 + $0x2] ss:$0 sm:$0xff] }
 0x231   : > { %v684_v50 = vpack.c.bf16 %v683_v49, %v683_v49 }
 0x233   : > { %1548 = vmatmul.msk.bf16.vlgmr.msrb.gmra.mxu0 %vm653_vm1, %v684_v50 }
 0x234   : > { %934 = vmatpush.bf16.msrb.mxu0 %v1731_v15 }
 0x238   : > { %935 = vmatpush.bf16.msrb.mxu0 %v1730_v16 }
 0x243   : > { %1591 = vmatmul.msk.bf16.vlgmr.msra.gmra.mxu0 %vm653_vm1, %v742_v53 }
 0x253   : > { %1609 = vmatmul.msk.bf16.vlgmr.msrb.gmra.mxu0 %vm567_vm0, %v2053_v5 }
 0x2b0   : > { %v701_v58 = vpop.f32.mrf.mxu0 }
 0x2b1   : > { %v705_v60 = vpack.c.bf16 %v701_v58, %v701_v58  ;;  %v1736_v58 = vld [vmem:[%s2340_s23 + $0x30] sm:$0xff] }
 0x2b3   : > { %1595 = vmatmul.msk.bf16.vlgmr.msra.gmra.mxu3 %vm653_vm1, %v705_v60  ;;  %v1071_v60 = vsel %vm688_vm2, %v1640_v59, 0 }
 0x2b8   : > { %v703_v0 = vpop.f32.mrf.mxu0 }
 0x2c0   : > { %v830_v1 = vpop.f32.mrf.mxu0 }
 0x2c1   : > { %v834_v2 = vsel %vm653_vm1, %v830_v1, -inf }
 0x2c2   : > { %835 = vmax.xlane.f32.xlu1 %v834_v2 }
 0x2c8   : > { %v832_v3 = vpop.f32.mrf.mxu0 }
 0x2d0   : > { %v937_v23 = vpop.f32.mrf.mxu0 }
 0x2d1   : > { %v938_v34 = vadd.f32 %v1795_v31, %v937_v23 }
 0x2d3   : > { %v941_v36 = vpack.c.bf16 %v938_v34, %v938_v34 }
 0x2d8   : > { %v939_v24 = vpop.f32.mrf.mxu0 }
 0x335   : > { %v836_v6 = vpop.xlane.xlu1 %835 }
 0x336   : > { %v837_v7 = vsub.f32 %v830_v1, %v836_v6  ;;  %v2124_v8 = vpop.f32.mrf.mxu3  ;;  %v1797_v1 = vld [vmem:[%s2308_s5 + $0x3] ss:$0 sm:$0xff] }
 0x338   : > { %v838_v9 = vmul.f32 1.442695, %v837_v7 }
 0x33a   : > { %1811 = vpow2.f32 %v838_v9 }
 0x33e   : > { %v904_v10 = vpop.f32.mrf.mxu3 }
 0x340   : > { %v1812_v11 = vpop.eup %1811 }
 0x341   : > { %v840_v12 = vsel %vm653_vm1, %v1812_v11, 0.0 }
 0x342   : > { %841 = vadd.xlane.f32.xlu1 %v840_v12 }
 0x3b5   : > { %v842_v17 = vpop.xlane.xlu1 %841 }
 0x3b6   : > { %1813 = vrcp.f32 %v842_v17 }
 0x3bc   : > { %v1814_v18 = vpop.eup %1813 }
 0x3bd   : > { %v844_v19 = vmul.f32 %v1814_v18, %v1812_v11  ;;  %v1741_v18 = vld [vmem:[%s2306_s3 + $0x38] sm:$0xff] }
 0x3bf   : > { %v845_v20 = vpack.c.bf16 %v844_v19, %v844_v19  ;;  %v1740_v19 = vld [vmem:[%s2306_s3 + $0x30] sm:$0xff] }
 0x3c1   : > { %1592 = vmatmul.msk.bf16.vlgmr.msra.gmra.mxu1 %vm653_vm1, %v845_v20 }
 0x3c2   : > { %1080 = vmatpush.bf16.msra.mxu1 %v1071_v60 }
 0x3d1   : > { %1623 = vmatmul.msk.bf16.vlgmr.msrb.gmra.mxu1 %vm567_vm0, %v2053_v5 }
 0x43e   : > { %v861_v25 = vpop.f32.mrf.mxu1 }
 0x43f   : > { %v865_v26 = vpack.c.bf16 %v861_v25, %v861_v25 }
 0x441   : > { %1594 = vmatmul.msk.bf16.vlgmr.msra.gmra.mxu2 %vm653_vm1, %v865_v26 }
 0x442   : > { %1115 = vmatpush.bf16.msra.mxu2 %v1737_v57 }
 0x446   : > { %v863_v27 = vpop.f32.mrf.mxu1  ;;  %1116 = vmatpush.bf16.msra.mxu2 %v1736_v58 }
 0x447   : > { %v1799_v27 = vld [vmem:[%s2309_s6 + $0x3] ss:$0 sm:$0xff] }
 0x44e   : > { %v973_v29 = vpop.f32.mrf.mxu1 }
 0x44f   : > { %v974_v30 = vadd.f32 %v1794_v28, %v973_v29 }
 0x451   : > { %v977_v32 = vpack.c.bf16 %v974_v30, %v974_v30  ;;  %1637 = vmatmul.msk.bf16.vlgmr.msrb.gmra.mxu2 %vm567_vm0, %v2053_v5 }
 0x453   : > { %v1018_v33 = vsel %vm653_vm1, %v977_v32, 0 }
 0x454   : > { %1027 = vmatpush.bf16.xpose.msrb.mxu3 %v1018_v33 }
 0x456   : > { %v975_v35 = vpop.f32.mrf.mxu1 }
 0x45b   : > { %1638 = vmatmul.msk.bf16.vlgmr.msrb.gmra.mxu3 %vm653_vm1, %v941_v36  ;;  %v1686_v36 = vld [vmem:[%s2310_s7 + $0xc] sm:$0xf] }
 0x45c   : > { %1151 = vmatpush.bf16.msra.mxu3 %v1739_v44 }
 0x460   : > { %1152 = vmatpush.bf16.msra.mxu3 %v1738_v56 }
 0x461   : > { %1655 = vmatmul.msk.bf16.vlgmr.msra.gmra.mxu2 %vm567_vm0, %v2053_v5 }
 0x46b   : > { %1669 = vmatmul.msk.bf16.vlgmr.msra.gmra.mxu3 %vm567_vm0, %v2053_v5 }
 0x4c4   : > { %v2157_v37 = vpop.f32.mrf.mxu2 }
 0x4c5   : > { %v903_v20 = vadd.f32 %v2124_v8, %v2157_v37  ;;  %v1252_v37 = vsel %vm688_vm2, %v1686_v36, 0 }
 0x4c6   : > { %1261 = vmatpush.bf16.msrb.mxu3 %v1252_v37 }
 0x4cc   : > { %v885_v40 = vpop.f32.mrf.mxu2 }
 0x4d4   : > { %v1009_v46 = vpop.f32.mrf.mxu2 }
 0x4d5   : > { %v1010_v48 = vadd.f32 %v1796_v45, %v1009_v46  ;;  %v1800_v45 = vld [vmem:[%s2311_s8] ss:$0 sm:$0xff] }
 0x4d7   : > { %v1013_v50 = vpack.c.bf16 %v1010_v48, %v1010_v48 }
 0x4d9   : > { %v1049_v52 = vsel %vm688_vm2, %v1013_v50, 0 }
 0x4da   : > { %1058 = vmatpush.bf16.msra.mxu0 %v1049_v52  ;;  %v1893_v52 = vmov 32.0  }
 0x4dc   : > { %v1011_v53 = vpop.f32.mrf.mxu2 }
 0x4de   : > { %v1029_v41 = vpop.f32.mrf.mxu3  ;;  %1187 = vmatpush.bf16.msrb.mxu0 %v1741_v18 }
 0x4df   : > { %v1033_v42 = vsel %vm653_vm1, %v1029_v41, -inf }
 0x4e0   : > { %1034 = vmax.xlane.f32.xlu2 %v1033_v42 }
 0x4e2   : > { %1188 = vmatpush.bf16.msrb.mxu0 %v1740_v19 }
 0x4e4   : > { %v1118_v10 = vpop.f32.mrf.mxu2 }
 0x4e5   : > { %v1119_v16 = vadd.f32 %v1798_v14, %v1118_v10 }
 0x4e6   : > { %v1031_v43 = vpop.f32.mrf.mxu3 }
 0x4e7   : > { %v1122_v17 = vpack.c.bf16 %v1119_v16, %v1119_v16 }
 0x4ec   : > { %v1120_v11 = vpop.f32.mrf.mxu2 }
 0x4ee   : > { %v1154_v2 = vpop.f32.mrf.mxu3 }
 0x4ef   : > { %v1155_v3 = vadd.f32 %v1797_v1, %v1154_v2  ;;  %v1747_v1 = vld [vmem:[%s2316_s13 + $0x18] sm:$0xff] }
 0x4f1   : > { %v1158_v6 = vpack.c.bf16 %v1155_v3, %v1155_v3 }
 0x4f3   : > { %v1199_v7 = vsel %vm653_vm1, %v1158_v6, 0  ;;  %v1746_v6 = vld [vmem:[%s2316_s13 + $0x10] sm:$0xff] }
 0x4f4   : > { %1208 = vmatpush.bf16.xpose.msrb.mxu1 %v1199_v7 }
 0x4f6   : > { %v1156_v9 = vpop.f32.mrf.mxu3 }
 0x553   : > { %v1035_v47 = vpop.xlane.xlu2 %1034 }
 0x554   : > { %v1036_v49 = vsub.f32 %v1029_v41, %v1035_v47 }
 0x556   : > { %v1037_v51 = vmul.f32 1.442695, %v1036_v49 }
 0x558   : > { %1815 = vpow2.f32 %v1037_v51 }
 0x55e   : > { %v1816_v54 = vpop.eup %1815 }
 0x55f   : > { %v1039_v55 = vsel %vm653_vm1, %v1816_v54, 0.0 }
 0x560   : > { %1040 = vadd.xlane.f32.xlu2 %v1039_v55 }
 0x5d3   : > { %v1041_v61 = vpop.xlane.xlu2 %1040 }
 0x5d4   : > { %1817 = vrcp.f32 %v1041_v61 }
 0x5da   : > { %v1818_v62 = vpop.eup %1817 }
 0x5db   : > { %v1043_v63 = vmul.f32 %v1818_v62, %v1816_v54 }
 0x5dd   : > { %v1044_v0 = vpack.c.bf16 %v1043_v63, %v1043_v63 }
 0x5df   : > { %1639 = vmatmul.msk.bf16.vlgmr.msra.gmra.mxu0 %vm653_vm1, %v1044_v0  ;;  %v1742_v0 = vld [vmem:[%s2314_s11] sm:$0xff] }
 0x5ef   : > { %1683 = vmatmul.msk.bf16.vlgmr.msrb.gmra.mxu0 %vm567_vm0, %v2053_v5 }
 0x65c   : > { %v1060_v12 = vpop.f32.mrf.mxu0 }
 0x65d   : > { %v1064_v13 = vpack.c.bf16 %v1060_v12, %v1060_v12 }
 0x65f   : > { %1641 = vmatmul.msk.bf16.vlgmr.msra.gmra.mxu1 %vm653_vm1, %v1064_v13 }
 0x660   : > { %1396 = vmatpush.bf16.msra.mxu1 %v1747_v1 }
 0x664   : > { %v1062_v15 = vpop.f32.mrf.mxu0  ;;  %1397 = vmatpush.bf16.msra.mxu1 %v1746_v6 }
 0x665   : > { %v1801_v15 = vld [vmem:[%s2312_s9] ss:$0 sm:$0xff] }
 0x66c   : > { %v1190_v28 = vpop.f32.mrf.mxu0 }
 0x66d   : > { %v1191_v29 = vadd.f32 %v1799_v27, %v1190_v28 }
 0x66f   : > { %1684 = vmatmul.msk.bf16.vlgmr.msrb.gmra.mxu1 %vm653_vm1, %v1122_v17  ;;  %v1194_v30 = vpack.c.bf16 %v1191_v29, %v1191_v29  ;;  %v1802_v17 = vld [vmem:[%s2313_s10] ss:$0 sm:$0xff] }
 0x671   : > { %v1230_v8 = vsel %vm688_vm2, %v1194_v30, 0  ;;  %v1804_v30 = vld [vmem:[%s2317_s14] ss:$0 sm:$0xff] }
 0x672   : > { %1239 = vmatpush.bf16.msrb.mxu2 %v1230_v8 }
 0x674   : > { %v1192_v33 = vpop.f32.mrf.mxu0 }
 0x6dc   : > { %v1082_v21 = vpop.f32.mrf.mxu1 }
 0x6dd   : > { %v1086_v22 = vadd.f32 %v1082_v21, %v903_v20 }
 0x6e4   : > { %v1084_v23 = vpop.f32.mrf.mxu1 }
 0x6e5   : > { %v1744_v23 = vld [vmem:[%s2316_s13] sm:$0xff] }
 0x6ec   : > { %v1210_v24 = vpop.f32.mrf.mxu1 }
 0x6ed   : > { %v1214_v25 = vsel %vm653_vm1, %v1210_v24, -inf }
 0x6ee   : > { %1215 = vmax.xlane.f32.xlu0 %v1214_v25 }
 0x6f4   : > { %v1212_v26 = vpop.f32.mrf.mxu1 }
 0x761   : > { %v1216_v31 = vpop.xlane.xlu0 %1215 }
 0x762   : > { %v1217_v32 = vsub.f32 %v1210_v24, %v1216_v31  ;;  %v1803_v24 = vld [vmem:[%s2315_s12] ss:$0 sm:$0xff] }
 0x764   : > { %v1218_v5 = vmul.f32 1.442695, %v1217_v32 }
 0x766   : > { %1819 = vpow2.f32 %v1218_v5 }
 0x76c   : > { %v1820_v34 = vpop.eup %1819 }
 0x76d   : > { %v1220_v35 = vsel %vm653_vm1, %v1820_v34, 0.0 }
 0x76e   : > { %1221 = vadd.xlane.f32.xlu1 %v1220_v35 }
 0x7e1   : > { %v1222_v38 = vpop.xlane.xlu1 %1221 }
 0x7e2   : > { %1821 = vrcp.f32 %v1222_v38 }
 0x7e3   : > { %1823 = vrcp.f32 %v1893_v52 }
 0x7e8   : > { %v1822_v39 = vpop.eup %1821 }
 0x7e9   : > { %v1224_v40 = vmul.f32 %v1822_v39, %v1820_v34  ;;  %v1824_v53 = vpop.eup %1823 }
 0x7ea   : > { %v1280_v54 = vmul.f32 32.0, %v1824_v53  ;;  %vm1284_vm3 = vweird.f32 %v1824_v53 }
 0x7eb   : > { %v1225_v41 = vpack.c.bf16 %v1224_v40, %v1224_v40 }
 0x7ec   : > { %v1281_v55 = vsub.f32 1.0, %v1280_v54 }
 0x7ed   : > { %1685 = vmatmul.msk.bf16.vlgmr.msrb.gmra.mxu2 %vm653_vm1, %v1225_v41 }
 0x7ee   : > { %v1282_v56 = vmul.f32 %v1824_v53, %v1281_v55 }
 0x7f0   : > { %v1283_v57 = vadd.f32 %v1824_v53, %v1282_v56 }
 0x7f2   : > { %v1285_v58 = vsel %vm1284_vm3, %v1824_v53, %v1283_v57 }
 0x870   : > { %v1241_v42 = vpop.f32.mrf.mxu2 }
 0x871   : > { %v1245_v43 = vpack.c.bf16 %v1241_v42, %v1241_v42 }
 0x873   : > { %1687 = vmatmul.msk.bf16.vlgmr.msrb.gmra.mxu3 %vm653_vm1, %v1245_v43 }
 0x878   : > { %v1243_v44 = vpop.f32.mrf.mxu2 }
 0x8f6   : > { %v1263_v46 = vpop.f32.mrf.mxu3 }
 0x8f7   : > { %v1267_v47 = vadd.f32 %v1263_v46, %v1086_v22  ;;  %v1745_v22 = vld [vmem:[%s2316_s13 + $0x8] sm:$0xff] }
 0x8f8   : > { %1398 = vmatpush.bf16.msra.mxu1 %v1745_v22 }
 0x8f9   : > { %v1272_v48 = vadd.f32 %v1800_v45, %v1267_v47 }
 0x8fb   : > { %v1273_v49 = vadd.f32 %v1272_v48, %v2049_v4  ;;  %v1743_v4 = vld [vmem:[%s2314_s11 + $0x8] sm:$0xff]  ;;  %v1805_v48 = vld [vmem:[%s2318_s15] ss:$0 sm:$0xff] }
 0x8fc   : > { %1343 = vmatpush.bf16.msra.mxu0 %v1743_v4  ;;  %1399 = vmatpush.bf16.msra.mxu1 %v1744_v23 }
 0x8fd   : > { %v1276_v50 = vsel %vm567_vm0, %v1273_v49, 0.0 }
 0x8fe   : > { %1277 = vadd.xlane.f32.xlu2 %v1276_v50  ;;  %v1265_v51 = vpop.f32.mrf.mxu3 }
 0x8ff   : > { %v1806_v51 = vld [vmem:[%s2343_s30] ss:$0 sm:$0xff] }
 0x900   : > { %1344 = vmatpush.bf16.msra.mxu0 %v1742_v0 }
 0x971   : > { %v1278_v59 = vpop.xlane.xlu2 %1277 }
 0x972   : > { %v1286_v60 = vmul.f32 %v1285_v58, %v1278_v59 }
 0x974   : > { %v1287_v61 = vsub.f32 %v1273_v49, %v1286_v60 }
 0x976   : > { %v1288_v62 = vmul.f32 %v1287_v61, %v1287_v61 }
 0x978   : > { %v1289_v63 = vsel %vm567_vm0, %v1288_v62, 0.0 }
 0x979   : > { %1290 = vadd.xlane.f32.xlu0 %v1289_v63 }
 0x9ec   : > { %v1291_v2 = vpop.xlane.xlu0 %1290 }
 0x9ed   : > { %v1292_v3 = vmul.f32 %v1291_v2, %v1285_v58 }
 0x9ef   : > { %v1293_v7 = vadd.f32 1e-05, %v1292_v3 }
 0x9f1   : > { %1825 = vrsqrt.f32 %v1293_v7  ;;  %vm1300_vm5 = vweird.f32 %v1293_v7 }
 0x9f7   : > { %v1826_v9 = vpop.eup %1825 }
 0x9f8   : > { %v1295_v10 = vmul.f32 %v1826_v9, %v1293_v7  ;;  %vm1301_vm4 = vweird.f32 %v1826_v9 }
 0x9f9   : > { %vm1302_vm6 = vmor %vm1300_vm5, %vm1301_vm4 }
 0x9fa   : > { %v1296_v11 = vmul.f32 %v1826_v9, %v1295_v10 }
 0x9fc   : > { %v1297_v12 = vmul.f32 0.5, %v1296_v11 }
 0x9fe   : > { %v1298_v13 = vsub.f32 1.5, %v1297_v12 }
 0xa00   : > { %v1299_v14 = vmul.f32 %v1826_v9, %v1298_v13 }
 0xa02   : > { %v1303_v16 = vsel %vm1302_vm6, %v1826_v9, %v1299_v14 }
 0xa03   : > { %v1304_v18 = vmul.f32 %v1303_v16, %v1287_v61 }
 0xa05   : > { %v1308_v19 = vmul.f32 %v1801_v15, %v1304_v18 }
 0xa07   : > { %v1312_v20 = vadd.f32 %v1802_v17, %v1308_v19 }
 0xa09   : > { %v1313_v21 = vpack.c.bf16 %v1312_v20, %v1312_v20 }
 0xa0b   : > { %1696 = vmatmul.msk.bf16.vlgmr.msra.gmra.mxu0 %vm567_vm0, %v1313_v21 }
 0xa88   : > { %v1346_v25 = vpop.f32.mrf.mxu0 }
 0xa89   : > { %v1347_v26 = vadd.f32 %v1803_v24, %v1346_v25 }
 0xa8b   : > { %v1350_v27 = vmax.f32 %v1347_v26, 0.0 }
 0xa8d   : > { %v1351_v28 = vpack.c.bf16 %v1350_v27, %v1350_v27 }
 0xa8f   : > { %1713 = vmatmul.msk.bf16.vlgmr.msra.gmra.mxu1 %vm1388_vm7, %v1351_v28 }
 0xa90   : > { %v1348_v29 = vpop.f32.mrf.mxu0 }
 0xb0c   : > { %v1401_v8 = vpop.f32.mrf.mxu1 }
 0xb0d   : > { %v1402_v31 = vadd.f32 %v1804_v30, %v1401_v8 }
 0xb0f   : > { %v1405_v32 = vadd.f32 %v1402_v31, %v1312_v20 }
 0xb11   : > { %v1408_v33 = vsel %vm567_vm0, %v1405_v32, 0.0 }
 0xb12   : > { %1409 = vadd.xlane.f32.xlu1 %v1408_v33 }
 0xb14   : > { %v1403_v5 = vpop.f32.mrf.mxu1 }
 0xb85   : > { %v1410_v34 = vpop.xlane.xlu1 %1409 }
 0xb86   : > { %v1411_v35 = vmul.f32 %v1410_v34, %v1285_v58 }
 0xb88   : > { %v1412_v36 = vsub.f32 %v1405_v32, %v1411_v35 }
 0xb8a   : > { %v1413_v37 = vmul.f32 %v1412_v36, %v1412_v36 }
 0xb8c   : > { %v1414_v38 = vsel %vm567_vm0, %v1413_v37, 0.0 }
 0xb8d   : > { %1415 = vadd.xlane.f32.xlu2 %v1414_v38 }
 0xc00   : > { %v1416_v39 = vpop.xlane.xlu2 %1415 }
 0xc01   : > { %v1417_v40 = vmul.f32 %v1416_v39, %v1285_v58 }
 0xc03   : > { %v1418_v41 = vadd.f32 1e-05, %v1417_v40 }
 0xc05   : > { %1827 = vrsqrt.f32 %v1418_v41  ;;  %vm1425_vm9 = vweird.f32 %v1418_v41 }
 0xc0b   : > { %v1828_v42 = vpop.eup %1827 }
 0xc0c   : > { %v1420_v43 = vmul.f32 %v1828_v42, %v1418_v41  ;;  %vm1426_vm8 = vweird.f32 %v1828_v42 }
 0xc0d   : > { %vm1427_vm10 = vmor %vm1425_vm9, %vm1426_vm8 }
 0xc0e   : > { %v1421_v44 = vmul.f32 %v1828_v42, %v1420_v43 }
 0xc10   : > { %v1422_v45 = vmul.f32 0.5, %v1421_v44 }
 0xc12   : > { %v1423_v46 = vsub.f32 1.5, %v1422_v45 }
 0xc14   : > { %v1424_v47 = vmul.f32 %v1828_v42, %v1423_v46 }
 0xc16   : > { %v1428_v49 = vsel %vm1427_vm10, %v1828_v42, %v1424_v47 }
 0xc17   : > { %v1429_v50 = vmul.f32 %v1428_v49, %v1412_v36 }
 0xc19   : > { %v1433_v52 = vmul.f32 %v1805_v48, %v1429_v50 }
 0xc1b   : > { %v1437_v53 = vadd.f32 %v1806_v51, %v1433_v52 }
 0xc1d   : > { %1438 = vst.msk [vmem:[%s539_s18] sm:$0xff] %vm567_vm0, %v1437_v53 }
 0xc1e   : > { %1856 = shalt.err (!%p1853_p3)
}
 0xc1f   : > { %1748 = dma.vmem_to_hbm [thread:$0]  (%p2022_p5), %s1453_s28, 128, %s1455_s2, %s1440_s0  }
 0xc20 PF: > { %s2344_s21 = sld [smem:[#allocation7_spill]] }
 0xc21   : > { %s2345_s29 = sld [smem:[#allocation5_spill]] }
 0xc26   : > { %p1754_p4 = scmp.ge.s32.totalorder %s2344_s21, 2 }
 0xc27   : > { %s1466_s18 = sand.u32 1, %s2345_s29  }
 0xc28   : > { %p1751_p7 = pnand %p1754_p4, %p2026_p6  ;;  %s1467_s16 = scalar_lea.sflag [#allocation3], %s1466_s18 }
 0xc2a   : > { %p1752_p8 = pneg %p1751_p7 }
 0xc2c   : > { %1874 = dma.done.wait (%p1752_p8), %s1467_s16, 128  }
 0xc2d   : > { %1876 = vsyncadd (%p1752_p8), %s1467_s16, 4294967168  ;;  %s2347_s27 = sld [smem:[#allocation8_spill]]  ;;  %s2350_s24 = smov %s1883_s25 }
 0xc2e   : > { %s2348_s26 = sld [smem:[#allocation6_spill]] }
 0xc2f   : > { %s2349_s22 = sld [smem:[#allocation9_spill]] }
 0xc33   : > { %p27_p9 = scmp.ge.s32.totalorder %s2347_s27, 4  }
 0xc34   : > { %s2351_s25 = smov %s2348_s26 }
 0xc35   : > { %s2352_s26 = smov %s2349_s22  ;;  %29 = sbr.rel (!%p27_p9) target bundleno = 8 (0x8), region = 144 }
 0xc3a   :  { %1473 = vsyncpa [#allocation3], 1 }
 0xc3b   :  { %1475 = vsyncpa [#allocation3 + $0x1], 1 }

</bundles_post_ra>
